<compile_context>
chip_gen: v5e
topology: v5e:2x2
jax: 0.10.0
libtpu: 0.0.40
codegen_flags: <defaults>
</compile_context>

<pallas_src>
import functools
import math

import jax
import jax.numpy as jnp
from jax import lax
from jax.experimental import pallas as pl
from jax.experimental.pallas import tpu as pltpu


# Row layout of the packed per-layer vector array (L, 15, E):
#  0: sa q bias (scale folded)   1: sa k bias   2: sa v bias   3: sa out bias
#  4: ca q bias (scale folded)   5: ca k bias   6: ca v bias   7: ca out bias
#  8: ffn output (w2) bias
#  9/10/11: LayerNorm1/2/3 gamma      12/13/14: LayerNorm1/2/3 beta
_N_VEC_ROWS = 15


# ----------------------------- fused kernel --------------------------------

def _decoder_kernel(tgt_ref, mem_ref,
                    sa_wqkv_ref, sa_wo_ref,
                    ca_wq_ref, ca_wkv_ref, ca_wo_ref,
                    w1_ref, w2_ref,
                    vec_ref, b1_ref,
                    fin_g_ref, fin_b_ref,
                    out_ref, x_ref,
                    *, nhead, eps, causal, has_final_norm):
    l = pl.program_id(1)
    n_layers = pl.num_programs(1)

    b_t, T, E = tgt_ref.shape            # block sizes (static)
    S = mem_ref.shape[1]
    Dh = E // nhead
    M = b_t * T

    # Load tgt into the layer-carried VMEM scratch on the first layer.
    @pl.when(l == 0)
    def _():
        x_ref[...] = tgt_ref[...].reshape(M, E).astype(jnp.float32)

    x = x_ref[...]                                       # (M, E) f32
    mem = mem_ref[...].reshape(b_t * S, E)               # (b_t*S, E) bf16
    vec = vec_ref[0]                                     # (15, E) f32

    def mm(a, w):
        # bf16 MXU matmul with f32 accumulation; M = b_t*T (or b_t*S) rows.
        return jnp.dot(a.astype(jnp.bfloat16), w,
                       preferred_element_type=jnp.float32)

    def layer_norm(y, g, b):
        mean = jnp.mean(y, axis=-1, keepdims=True)
        var = jnp.mean(jnp.square(y - mean), axis=-1, keepdims=True)
        return (y - mean) * lax.rsqrt(var + eps) * g + b

    def attention(q, k, v, wo, t_q, t_k, mask):
        # q: (b_t*t_q, E) f32 (scale already folded into the Q projection),
        # k/v: (b_t*t_k, E) f32, wo: (E, E) bf16.
        # Heads are merged by accumulating each head's output through its row
        # slice of the output projection (no lane-dim concat / masked stores).
        outs = []
        for b in range(b_t):
            qb = q[b * t_q:(b + 1) * t_q, :].astype(jnp.bfloat16)
            kb = k[b * t_k:(b + 1) * t_k, :].astype(jnp.bfloat16)
            vb = v[b * t_k:(b + 1) * t_k, :].astype(jnp.bfloat16)
            acc = jnp.zeros((t_q, E), jnp.float32)
            for h in range(nhead):
                sl = slice(h * Dh, (h + 1) * Dh)
                s = lax.dot_general(qb[:, sl], kb[:, sl],
                                    (((1,), (1,)), ((), ())),
                                    preferred_element_type=jnp.float32)
                if mask is not None:
                    s = jnp.where(mask, s, jnp.float32(-1e9))
                s = s - jnp.max(s, axis=-1, keepdims=True)
                p = jnp.exp(s)
                p = p * pl.reciprocal(jnp.sum(p, axis=-1, keepdims=True),
                                      approx=True)
                oh = jnp.dot(p.astype(jnp.bfloat16), vb[:, sl],
                             preferred_element_type=jnp.float32)    # (t_q, Dh)
                acc = acc + jnp.dot(oh.astype(jnp.bfloat16), wo[sl, :],
                                    preferred_element_type=jnp.float32)
            outs.append(acc)
        return outs[0] if b_t == 1 else jnp.concatenate(outs, axis=0)

    # Causal mask as a boolean, fused into the score select (no f32 temp).
    if causal:
        row = lax.broadcasted_iota(jnp.int32, (T, T), 0)
        col = lax.broadcasted_iota(jnp.int32, (T, T), 1)
        causal_mask = row >= col
    else:
        causal_mask = None

    # ---------------- self-attention block (post-norm) ----------------
    qkv = mm(x, sa_wqkv_ref[0])                           # (M, 3E)
    q = qkv[:, 0:E] + vec[0:1, :]
    k = qkv[:, E:2 * E] + vec[1:2, :]
    v = qkv[:, 2 * E:3 * E] + vec[2:3, :]
    sa = attention(q, k, v, sa_wo_ref[0], T, T, causal_mask) + vec[3:4, :]
    x = layer_norm(x + sa, vec[9:10, :], vec[12:13, :])

    # ---------------- cross-attention block ----------------
    q = mm(x, ca_wq_ref[0]) + vec[4:5, :]                 # (M, E)
    kv = mm(mem, ca_wkv_ref[0])                           # (b_t*S, 2E)
    k = kv[:, 0:E] + vec[5:6, :]
    v = kv[:, E:2 * E] + vec[6:7, :]
    ca = attention(q, k, v, ca_wo_ref[0], T, S, None) + vec[7:8, :]
    x = layer_norm(x + ca, vec[10:11, :], vec[13:14, :])

    # ---------------- feed-forward block ----------------
    h = jnp.maximum(mm(x, w1_ref[0]) + b1_ref[0], 0.0)    # (M, dff)
    ff = mm(h, w2_ref[0]) + vec[8:9, :]
    x = layer_norm(x + ff, vec[11:12, :], vec[14:15, :])

    x_ref[...] = x

    # Write the output (with optional final norm, no fake residual) once.
    @pl.when(l == n_layers - 1)
    def _():
        y = layer_norm(x, fin_g_ref[...], fin_b_ref[...]) if has_final_norm else x
        out_ref[...] = y.reshape(b_t, T, E).astype(out_ref.dtype)


# ------------------------------ wrapper -------------------------------------

def transformer_decoder(tgt, memory, params, final_norm, nhead,
                        causal_tgt_mask=True, eps=1e-5, batch_tile=None):
    """tgt: (B, T, E), memory: (B, S, E) -> (B, T, E).

    `params` must come from init_params (1/sqrt(Dh) already folded into the Q
    projections, per-layer vectors packed into params['vec_pack']).
    """
    B, T, E = tgt.shape
    S = memory.shape[1]
    L = params['sa_wqkv'].shape[0]
    dff = params['w1'].shape[-1]

    if batch_tile is None:
        # >=2 batch blocks keeps both v7x TensorCores busy; on single-TC chips
        # (v5e/v6e) pass batch_tile=B for a single full-batch block per layer.
        batch_tile = 1
        for cand in range(max(1, B // 2), 0, -1):
            if B % cand == 0:
                batch_tile = cand
                break
    assert B % batch_tile == 0
    nb = B // batch_tile

    # memory is only consumed as a bf16 MXU operand -> halve its DMA bytes.
    memory = memory.astype(jnp.bfloat16)

    has_final = final_norm is not None
    if final_norm is None:
        final_norm = dict(g=jnp.ones((1, E), jnp.float32),
                          b=jnp.zeros((1, E), jnp.float32))

    act_spec = lambda n: pl.BlockSpec((batch_tile, n, E), lambda bb, l: (bb, 0, 0))
    layer_spec = lambda shp: pl.BlockSpec((1,) + shp[1:], lambda bb, l: (l, 0, 0))
    const_spec = lambda shp: pl.BlockSpec(shp, lambda bb, l: (0, 0))

    in_specs = [
        act_spec(T), act_spec(S),
        layer_spec(params['sa_wqkv'].shape), layer_spec(params['sa_wo'].shape),
        layer_spec(params['ca_wq'].shape), layer_spec(params['ca_wkv'].shape),
        layer_spec(params['ca_wo'].shape),
        layer_spec(params['w1'].shape), layer_spec(params['w2'].shape),
        layer_spec(params['vec_pack'].shape), layer_spec(params['b1'].shape),
        const_spec(final_norm['g'].shape), const_spec(final_norm['b'].shape),
    ]

    # Explicit VMEM budget: double-buffered per-layer working set + activations
    # + matmul temporaries, with headroom (default scoped limits are too small
    # for realistic E/dff).
    per_layer_bytes = 0
    for name in ('sa_wqkv', 'sa_wo', 'ca_wq', 'ca_wkv', 'ca_wo',
                 'w1', 'w2', 'vec_pack', 'b1'):
        a = params[name]
        per_layer_bytes += math.prod(a.shape[1:]) * a.dtype.itemsize
    act_bytes = batch_tile * (T * 4 + S * 2) * E                 # tgt f32 + mem bf16
    out_bytes = batch_tile * T * E * jnp.dtype(tgt.dtype).itemsize
    scratch_bytes = batch_tile * T * E * 4
    work_bytes = 4 * batch_tile * max(T, S) * max(3 * E, dff) * 4
    vmem_limit = 2 * (per_layer_bytes + act_bytes + out_bytes) \
        + scratch_bytes + work_bytes + (8 << 20)
    vmem_limit = int(min(max(vmem_limit, 32 << 20), 128 << 20))

    kernel = functools.partial(_decoder_kernel, nhead=nhead, eps=eps,
                               causal=causal_tgt_mask, has_final_norm=has_final)

    return pl.pallas_call(
        kernel,
        out_shape=jax.ShapeDtypeStruct((B, T, E), tgt.dtype),
        grid_spec=pltpu.PrefetchScalarGridSpec(
            num_scalar_prefetch=0,
            grid=(nb, L),                       # (batch blocks, layer)
            in_specs=in_specs,
            out_specs=pl.BlockSpec((batch_tile, T, E), lambda bb, l: (bb, 0, 0)),
            scratch_shapes=[pltpu.VMEM((batch_tile * T, E), jnp.float32)],
        ),
        compiler_params=pltpu.CompilerParams(
            dimension_semantics=("parallel", "arbitrary"),
            vmem_limit_bytes=vmem_limit),
    )(tgt, memory,
      params['sa_wqkv'], params['sa_wo'],
      params['ca_wq'], params['ca_wkv'], params['ca_wo'],
      params['w1'], params['w2'],
      params['vec_pack'], params['b1'],
      final_norm['g'], final_norm['b'])


# --------------------------- Parameter init --------------------------------

def init_params(key, num_layers, E, dff, nhead):
    """Per-layer params stacked along a leading layer axis.

    Matmul weights are bf16, 1/sqrt(Dh) is folded into the Q projections, and
    all E-wide per-layer vectors are packed into params['vec_pack'] (L, 15, E).
    """
    L = num_layers
    Dh = E // nhead
    scale = 1.0 / math.sqrt(Dh)

    def w(k, shp):
        return jax.random.normal(k, shp, jnp.float32) * 0.05

    ks = jax.random.split(key, 7)

    sa_wqkv = w(ks[0], (L, E, 3 * E))
    sa_wqkv = sa_wqkv.at[:, :, :E].multiply(scale)       # fold scale into Q cols
    ca_wq = w(ks[2], (L, E, E)) * scale                  # fold scale into Q proj

    # Packed per-layer vectors: biases are zero, LN gammas (rows 9..11) are 1.
    vec_pack = jnp.zeros((L, _N_VEC_ROWS, E), jnp.float32)
    vec_pack = vec_pack.at[:, 9:12, :].set(1.0)

    return dict(
        sa_wqkv=sa_wqkv.astype(jnp.bfloat16),
        sa_wo=w(ks[1], (L, E, E)).astype(jnp.bfloat16),
        ca_wq=ca_wq.astype(jnp.bfloat16),
        ca_wkv=w(ks[3], (L, E, 2 * E)).astype(jnp.bfloat16),
        ca_wo=w(ks[4], (L, E, E)).astype(jnp.bfloat16),
        w1=w(ks[5], (L, E, dff)).astype(jnp.bfloat16),
        w2=w(ks[6], (L, dff, E)).astype(jnp.bfloat16),
        vec_pack=vec_pack,
        b1=jnp.zeros((L, 1, dff), jnp.float32),
    )


# --------------------------------- Main -------------------------------------

if __name__ == "__main__":
    B, T, S, E = 2, 8, 12, 32
    NHEAD, DFF, NUM_LAYERS = 4, 64, 2

    root = jax.random.PRNGKey(0)
    k_tgt, k_mem, k_params = jax.random.split(root, 3)

    tgt = jax.random.normal(k_tgt, (B, T, E), jnp.float32)
    memory = jax.random.normal(k_mem, (B, S, E), jnp.float32)

    params = init_params(k_params, NUM_LAYERS, E, DFF, NHEAD)
    final_norm = dict(g=jnp.ones((1, E), jnp.float32),
                      b=jnp.zeros((1, E), jnp.float32))

    decoder = jax.jit(functools.partial(transformer_decoder,
                                        nhead=NHEAD, causal_tgt_mask=True))
    out = decoder(tgt, memory, params, final_norm)
    out = jax.block_until_ready(out)

    assert out.shape == (B, T, E)
    assert bool(jnp.all(jnp.isfinite(out)))
    print("KERNEL_OK")
</pallas_src>

<mosaic_0001>
module attributes {stable_mosaic.version = 11 : i64} {
  func.func @_decoder_kernel(%arg0: i32, %arg1: i32, %arg2: memref<1x8x32xf32, #tpu.memory_space<vmem>>, %arg3: memref<1x12x32xbf16, #tpu.memory_space<vmem>>, %arg4: memref<1x32x96xbf16, #tpu.memory_space<vmem>>, %arg5: memref<1x32x32xbf16, #tpu.memory_space<vmem>>, %arg6: memref<1x32x32xbf16, #tpu.memory_space<vmem>>, %arg7: memref<1x32x64xbf16, #tpu.memory_space<vmem>>, %arg8: memref<1x32x32xbf16, #tpu.memory_space<vmem>>, %arg9: memref<1x32x64xbf16, #tpu.memory_space<vmem>>, %arg10: memref<1x64x32xbf16, #tpu.memory_space<vmem>>, %arg11: memref<1x15x32xf32, #tpu.memory_space<vmem>>, %arg12: memref<1x1x64xf32, #tpu.memory_space<vmem>>, %arg13: memref<1x32xf32, #tpu.memory_space<vmem>>, %arg14: memref<1x32xf32, #tpu.memory_space<vmem>>, %arg15: memref<1x8x32xf32, #tpu.memory_space<vmem>>, %arg16: memref<8x32xf32, #tpu.memory_space<vmem>>) attributes {dimension_semantics = [#tpu.dimension_semantics<parallel>, #tpu.dimension_semantics<arbitrary>], iteration_bounds = array<i64: 2, 2>, scalar_prefetch = 0 : i64, scratch_operands = 1 : i64, tpu.core_type = #tpu.core_type<tc>, window_params = [{transform_indices = @transform_0, window_bounds = array<i64: 1, 8, 32>}, {transform_indices = @transform_1, window_bounds = array<i64: 1, 12, 32>}, {transform_indices = @transform_2, window_bounds = array<i64: 1, 32, 96>}, {transform_indices = @transform_3, window_bounds = array<i64: 1, 32, 32>}, {transform_indices = @transform_4, window_bounds = array<i64: 1, 32, 32>}, {transform_indices = @transform_5, window_bounds = array<i64: 1, 32, 64>}, {transform_indices = @transform_6, window_bounds = array<i64: 1, 32, 32>}, {transform_indices = @transform_7, window_bounds = array<i64: 1, 32, 64>}, {transform_indices = @transform_8, window_bounds = array<i64: 1, 64, 32>}, {transform_indices = @transform_9, window_bounds = array<i64: 1, 15, 32>}, {transform_indices = @transform_10, window_bounds = array<i64: 1, 1, 64>}, {pipeline_mode = #tpu.pipeline_mode<synchronous>, transform_indices = @transform_11, window_bounds = array<i64: 1, 32>}, {pipeline_mode = #tpu.pipeline_mode<synchronous>, transform_indices = @transform_12, window_bounds = array<i64: 1, 32>}, {transform_indices = @transform_13, window_bounds = array<i64: 1, 8, 32>}]} {
    %c0_i32 = arith.constant 0 : i32
    %0 = arith.cmpi eq, %arg1, %c0_i32 : i32
    %1 = arith.extui %0 : i1 to i32
    %c0_i32_0 = arith.constant 0 : i32
    %2 = arith.cmpi ne, %1, %c0_i32_0 : i32
    scf.if %2 {
      %c0_101 = arith.constant 0 : index
      %c0_102 = arith.constant 0 : index
      %c0_103 = arith.constant 0 : index
      %327 = vector.load %arg2[%c0_101, %c0_102, %c0_103] : memref<1x8x32xf32, #tpu.memory_space<vmem>>, vector<1x8x32xf32>
      %328 = vector.shape_cast %327 : vector<1x8x32xf32> to vector<8x32xf32>
      %c0_104 = arith.constant 0 : index
      %c0_105 = arith.constant 0 : index
      %329 = vector.load %arg16[%c0_104, %c0_105] : memref<8x32xf32, #tpu.memory_space<vmem>>, vector<8x32xf32>
      tpu.vector_store %arg16[%c0_104, %c0_105], %328 {strides = array<i32>} : memref<8x32xf32, #tpu.memory_space<vmem>>, vector<8x32xf32>,
    } else {
    }
    %c0 = arith.constant 0 : index
    %c0_1 = arith.constant 0 : index
    %3 = vector.load %arg16[%c0, %c0_1] : memref<8x32xf32, #tpu.memory_space<vmem>>, vector<8x32xf32>
    %c0_2 = arith.constant 0 : index
    %c0_3 = arith.constant 0 : index
    %c0_4 = arith.constant 0 : index
    %4 = vector.load %arg3[%c0_2, %c0_3, %c0_4] : memref<1x12x32xbf16, #tpu.memory_space<vmem>>, vector<1x12x32xbf16>
    %5 = vector.shape_cast %4 : vector<1x12x32xbf16> to vector<12x32xbf16>
    %c0_5 = arith.constant 0 : index
    %c0_6 = arith.constant 0 : index
    %c0_7 = arith.constant 0 : index
    %6 = vector.load %arg11[%c0_5, %c0_6, %c0_7] : memref<1x15x32xf32, #tpu.memory_space<vmem>>, vector<1x15x32xf32>
    %7 = vector.shape_cast %6 : vector<1x15x32xf32> to vector<15x32xf32>
    %8 = tpu.iota {dimensions = array<i32: 0>} : vector<8x8xi32>
    %9 = tpu.iota {dimensions = array<i32: 1>} : vector<8x8xi32>
    %10 = arith.cmpi sge, %8, %9 : vector<8x8xi32>
    %c0_8 = arith.constant 0 : index
    %c0_9 = arith.constant 0 : index
    %c0_10 = arith.constant 0 : index
    %11 = vector.load %arg4[%c0_8, %c0_9, %c0_10] : memref<1x32x96xbf16, #tpu.memory_space<vmem>>, vector<1x32x96xbf16>
    %12 = vector.shape_cast %11 : vector<1x32x96xbf16> to vector<32x96xbf16>
    %13 = arith.truncf %3 : vector<8x32xf32> to vector<8x32xbf16>
    %cst = arith.constant dense<0.000000e+00> : vector<8x96xf32>
    %14 = tpu.matmul %13, %12, %cst {dimension_numbers = #tpu.dot_dimension_numbers<[1], [0], [0], [1], [0, 0, 1, 1], [], []>} : vector<8x32xbf16>, vector<32x96xbf16>, vector<8x96xf32> -> vector<8x96xf32>
    %15 = vector.extract_strided_slice %14 {offsets = [0, 0], sizes = [8, 32], strides = [1, 1]} : vector<8x96xf32> to vector<8x32xf32>
    %16 = vector.extract_strided_slice %7 {offsets = [0, 0], sizes = [1, 32], strides = [1, 1]} : vector<15x32xf32> to vector<1x32xf32>
    %17 = vector.broadcast %16 : vector<1x32xf32> to vector<8x32xf32>
    %18 = arith.addf %15, %17 : vector<8x32xf32>
    %19 = vector.extract_strided_slice %14 {offsets = [0, 32], sizes = [8, 32], strides = [1, 1]} : vector<8x96xf32> to vector<8x32xf32>
    %20 = vector.extract_strided_slice %7 {offsets = [1, 0], sizes = [1, 32], strides = [1, 1]} : vector<15x32xf32> to vector<1x32xf32>
    %21 = vector.broadcast %20 : vector<1x32xf32> to vector<8x32xf32>
    %22 = arith.addf %19, %21 : vector<8x32xf32>
    %23 = vector.extract_strided_slice %14 {offsets = [0, 64], sizes = [8, 32], strides = [1, 1]} : vector<8x96xf32> to vector<8x32xf32>
    %24 = vector.extract_strided_slice %7 {offsets = [2, 0], sizes = [1, 32], strides = [1, 1]} : vector<15x32xf32> to vector<1x32xf32>
    %25 = vector.broadcast %24 : vector<1x32xf32> to vector<8x32xf32>
    %26 = arith.addf %23, %25 : vector<8x32xf32>
    %c0_11 = arith.constant 0 : index
    %c0_12 = arith.constant 0 : index
    %c0_13 = arith.constant 0 : index
    %27 = vector.load %arg5[%c0_11, %c0_12, %c0_13] : memref<1x32x32xbf16, #tpu.memory_space<vmem>>, vector<1x32x32xbf16>
    %28 = vector.shape_cast %27 : vector<1x32x32xbf16> to vector<32x32xbf16>
    %29 = arith.truncf %18 : vector<8x32xf32> to vector<8x32xbf16>
    %30 = arith.truncf %22 : vector<8x32xf32> to vector<8x32xbf16>
    %31 = arith.truncf %26 : vector<8x32xf32> to vector<8x32xbf16>
    %cst_14 = arith.constant 0.000000e+00 : f32
    %32 = vector.broadcast %cst_14 : f32 to vector<8x32xf32>
    %33 = vector.extract_strided_slice %29 {offsets = [0, 0], sizes = [8, 8], strides = [1, 1]} : vector<8x32xbf16> to vector<8x8xbf16>
    %34 = vector.extract_strided_slice %30 {offsets = [0, 0], sizes = [8, 8], strides = [1, 1]} : vector<8x32xbf16> to vector<8x8xbf16>
    %cst_15 = arith.constant dense<0.000000e+00> : vector<8x8xf32>
    %35 = tpu.matmul %33, %34, %cst_15 {dimension_numbers = #tpu.dot_dimension_numbers<[1], [1], [0], [0], [0, 0, 1, 0], [], []>} : vector<8x8xbf16>, vector<8x8xbf16>, vector<8x8xf32> -> vector<8x8xf32>
    %cst_16 = arith.constant -1.000000e+09 : f32
    %36 = vector.broadcast %cst_16 : f32 to vector<8x8xf32>
    %37 = arith.select %10, %35, %36 : vector<8x8xi1>, vector<8x8xf32>
    %cst_17 = arith.constant dense<0xFF800000> : vector<8xf32>
    %38 = vector.multi_reduction <maximumf>, %37, %cst_17 [1] : vector<8x8xf32> to vector<8xf32>
    %39 = vector.shape_cast %38 : vector<8xf32> to vector<8x1xf32>
    %40 = vector.broadcast %39 : vector<8x1xf32> to vector<8x8xf32>
    %41 = arith.subf %37, %40 : vector<8x8xf32>
    %42 = math.exp %41 : vector<8x8xf32>
    %cst_18 = arith.constant dense<0.000000e+00> : vector<8xf32>
    %43 = vector.multi_reduction <add>, %42, %cst_18 [1] : vector<8x8xf32> to vector<8xf32>
    %44 = vector.shape_cast %43 : vector<8xf32> to vector<8x1xf32>
    %45 = tpu.reciprocal %44 {approx = true} : vector<8x1xf32> -> vector<8x1xf32>
    %46 = vector.broadcast %45 : vector<8x1xf32> to vector<8x8xf32>
    %47 = arith.mulf %42, %46 : vector<8x8xf32>
    %48 = arith.truncf %47 : vector<8x8xf32> to vector<8x8xbf16>
    %49 = vector.extract_strided_slice %31 {offsets = [0, 0], sizes = [8, 8], strides = [1, 1]} : vector<8x32xbf16> to vector<8x8xbf16>
    %cst_19 = arith.constant dense<0.000000e+00> : vector<8x8xf32>
    %50 = tpu.matmul %48, %49, %cst_19 {dimension_numbers = #tpu.dot_dimension_numbers<[1], [0], [0], [1], [0, 0, 1, 1], [], []>} : vector<8x8xbf16>, vector<8x8xbf16>, vector<8x8xf32> -> vector<8x8xf32>
    %51 = arith.truncf %50 : vector<8x8xf32> to vector<8x8xbf16>
    %52 = vector.extract_strided_slice %28 {offsets = [0, 0], sizes = [8, 32], strides = [1, 1]} : vector<32x32xbf16> to vector<8x32xbf16>
    %cst_20 = arith.constant dense<0.000000e+00> : vector<8x32xf32>
    %53 = tpu.matmul %51, %52, %cst_20 {dimension_numbers = #tpu.dot_dimension_numbers<[1], [0], [0], [1], [0, 0, 1, 1], [], []>} : vector<8x8xbf16>, vector<8x32xbf16>, vector<8x32xf32> -> vector<8x32xf32>
    %54 = arith.addf %32, %53 : vector<8x32xf32>
    %55 = vector.extract_strided_slice %29 {offsets = [0, 8], sizes = [8, 8], strides = [1, 1]} : vector<8x32xbf16> to vector<8x8xbf16>
    %56 = vector.extract_strided_slice %30 {offsets = [0, 8], sizes = [8, 8], strides = [1, 1]} : vector<8x32xbf16> to vector<8x8xbf16>
    %cst_21 = arith.constant dense<0.000000e+00> : vector<8x8xf32>
    %57 = tpu.matmul %55, %56, %cst_21 {dimension_numbers = #tpu.dot_dimension_numbers<[1], [1], [0], [0], [0, 0, 1, 0], [], []>} : vector<8x8xbf16>, vector<8x8xbf16>, vector<8x8xf32> -> vector<8x8xf32>
    %cst_22 = arith.constant -1.000000e+09 : f32
    %58 = vector.broadcast %cst_22 : f32 to vector<8x8xf32>
    %59 = arith.select %10, %57, %58 : vector<8x8xi1>, vector<8x8xf32>
    %cst_23 = arith.constant dense<0xFF800000> : vector<8xf32>
    %60 = vector.multi_reduction <maximumf>, %59, %cst_23 [1] : vector<8x8xf32> to vector<8xf32>
    %61 = vector.shape_cast %60 : vector<8xf32> to vector<8x1xf32>
    %62 = vector.broadcast %61 : vector<8x1xf32> to vector<8x8xf32>
    %63 = arith.subf %59, %62 : vector<8x8xf32>
    %64 = math.exp %63 : vector<8x8xf32>
    %cst_24 = arith.constant dense<0.000000e+00> : vector<8xf32>
    %65 = vector.multi_reduction <add>, %64, %cst_24 [1] : vector<8x8xf32> to vector<8xf32>
    %66 = vector.shape_cast %65 : vector<8xf32> to vector<8x1xf32>
    %67 = tpu.reciprocal %66 {approx = true} : vector<8x1xf32> -> vector<8x1xf32>
    %68 = vector.broadcast %67 : vector<8x1xf32> to vector<8x8xf32>
    %69 = arith.mulf %64, %68 : vector<8x8xf32>
    %70 = arith.truncf %69 : vector<8x8xf32> to vector<8x8xbf16>
    %71 = vector.extract_strided_slice %31 {offsets = [0, 8], sizes = [8, 8], strides = [1, 1]} : vector<8x32xbf16> to vector<8x8xbf16>
    %cst_25 = arith.constant dense<0.000000e+00> : vector<8x8xf32>
    %72 = tpu.matmul %70, %71, %cst_25 {dimension_numbers = #tpu.dot_dimension_numbers<[1], [0], [0], [1], [0, 0, 1, 1], [], []>} : vector<8x8xbf16>, vector<8x8xbf16>, vector<8x8xf32> -> vector<8x8xf32>
    %73 = arith.truncf %72 : vector<8x8xf32> to vector<8x8xbf16>
    %74 = vector.extract_strided_slice %28 {offsets = [8, 0], sizes = [8, 32], strides = [1, 1]} : vector<32x32xbf16> to vector<8x32xbf16>
    %cst_26 = arith.constant dense<0.000000e+00> : vector<8x32xf32>
    %75 = tpu.matmul %73, %74, %cst_26 {dimension_numbers = #tpu.dot_dimension_numbers<[1], [0], [0], [1], [0, 0, 1, 1], [], []>} : vector<8x8xbf16>, vector<8x32xbf16>, vector<8x32xf32> -> vector<8x32xf32>
    %76 = arith.addf %54, %75 : vector<8x32xf32>
    %77 = vector.extract_strided_slice %29 {offsets = [0, 16], sizes = [8, 8], strides = [1, 1]} : vector<8x32xbf16> to vector<8x8xbf16>
    %78 = vector.extract_strided_slice %30 {offsets = [0, 16], sizes = [8, 8], strides = [1, 1]} : vector<8x32xbf16> to vector<8x8xbf16>
    %cst_27 = arith.constant dense<0.000000e+00> : vector<8x8xf32>
    %79 = tpu.matmul %77, %78, %cst_27 {dimension_numbers = #tpu.dot_dimension_numbers<[1], [1], [0], [0], [0, 0, 1, 0], [], []>} : vector<8x8xbf16>, vector<8x8xbf16>, vector<8x8xf32> -> vector<8x8xf32>
    %cst_28 = arith.constant -1.000000e+09 : f32
    %80 = vector.broadcast %cst_28 : f32 to vector<8x8xf32>
    %81 = arith.select %10, %79, %80 : vector<8x8xi1>, vector<8x8xf32>
    %cst_29 = arith.constant dense<0xFF800000> : vector<8xf32>
    %82 = vector.multi_reduction <maximumf>, %81, %cst_29 [1] : vector<8x8xf32> to vector<8xf32>
    %83 = vector.shape_cast %82 : vector<8xf32> to vector<8x1xf32>
    %84 = vector.broadcast %83 : vector<8x1xf32> to vector<8x8xf32>
    %85 = arith.subf %81, %84 : vector<8x8xf32>
    %86 = math.exp %85 : vector<8x8xf32>
    %cst_30 = arith.constant dense<0.000000e+00> : vector<8xf32>
    %87 = vector.multi_reduction <add>, %86, %cst_30 [1] : vector<8x8xf32> to vector<8xf32>
    %88 = vector.shape_cast %87 : vector<8xf32> to vector<8x1xf32>
    %89 = tpu.reciprocal %88 {approx = true} : vector<8x1xf32> -> vector<8x1xf32>
    %90 = vector.broadcast %89 : vector<8x1xf32> to vector<8x8xf32>
    %91 = arith.mulf %86, %90 : vector<8x8xf32>
    %92 = arith.truncf %91 : vector<8x8xf32> to vector<8x8xbf16>
    %93 = vector.extract_strided_slice %31 {offsets = [0, 16], sizes = [8, 8], strides = [1, 1]} : vector<8x32xbf16> to vector<8x8xbf16>
    %cst_31 = arith.constant dense<0.000000e+00> : vector<8x8xf32>
    %94 = tpu.matmul %92, %93, %cst_31 {dimension_numbers = #tpu.dot_dimension_numbers<[1], [0], [0], [1], [0, 0, 1, 1], [], []>} : vector<8x8xbf16>, vector<8x8xbf16>, vector<8x8xf32> -> vector<8x8xf32>
    %95 = arith.truncf %94 : vector<8x8xf32> to vector<8x8xbf16>
    %96 = vector.extract_strided_slice %28 {offsets = [16, 0], sizes = [8, 32], strides = [1, 1]} : vector<32x32xbf16> to vector<8x32xbf16>
    %cst_32 = arith.constant dense<0.000000e+00> : vector<8x32xf32>
    %97 = tpu.matmul %95, %96, %cst_32 {dimension_numbers = #tpu.dot_dimension_numbers<[1], [0], [0], [1], [0, 0, 1, 1], [], []>} : vector<8x8xbf16>, vector<8x32xbf16>, vector<8x32xf32> -> vector<8x32xf32>
    %98 = arith.addf %76, %97 : vector<8x32xf32>
    %99 = vector.extract_strided_slice %29 {offsets = [0, 24], sizes = [8, 8], strides = [1, 1]} : vector<8x32xbf16> to vector<8x8xbf16>
    %100 = vector.extract_strided_slice %30 {offsets = [0, 24], sizes = [8, 8], strides = [1, 1]} : vector<8x32xbf16> to vector<8x8xbf16>
    %cst_33 = arith.constant dense<0.000000e+00> : vector<8x8xf32>
    %101 = tpu.matmul %99, %100, %cst_33 {dimension_numbers = #tpu.dot_dimension_numbers<[1], [1], [0], [0], [0, 0, 1, 0], [], []>} : vector<8x8xbf16>, vector<8x8xbf16>, vector<8x8xf32> -> vector<8x8xf32>
    %cst_34 = arith.constant -1.000000e+09 : f32
    %102 = vector.broadcast %cst_34 : f32 to vector<8x8xf32>
    %103 = arith.select %10, %101, %102 : vector<8x8xi1>, vector<8x8xf32>
    %cst_35 = arith.constant dense<0xFF800000> : vector<8xf32>
    %104 = vector.multi_reduction <maximumf>, %103, %cst_35 [1] : vector<8x8xf32> to vector<8xf32>
    %105 = vector.shape_cast %104 : vector<8xf32> to vector<8x1xf32>
    %106 = vector.broadcast %105 : vector<8x1xf32> to vector<8x8xf32>
    %107 = arith.subf %103, %106 : vector<8x8xf32>
    %108 = math.exp %107 : vector<8x8xf32>
    %cst_36 = arith.constant dense<0.000000e+00> : vector<8xf32>
    %109 = vector.multi_reduction <add>, %108, %cst_36 [1] : vector<8x8xf32> to vector<8xf32>
    %110 = vector.shape_cast %109 : vector<8xf32> to vector<8x1xf32>
    %111 = tpu.reciprocal %110 {approx = true} : vector<8x1xf32> -> vector<8x1xf32>
    %112 = vector.broadcast %111 : vector<8x1xf32> to vector<8x8xf32>
    %113 = arith.mulf %108, %112 : vector<8x8xf32>
    %114 = arith.truncf %113 : vector<8x8xf32> to vector<8x8xbf16>
    %115 = vector.extract_strided_slice %31 {offsets = [0, 24], sizes = [8, 8], strides = [1, 1]} : vector<8x32xbf16> to vector<8x8xbf16>
    %cst_37 = arith.constant dense<0.000000e+00> : vector<8x8xf32>
    %116 = tpu.matmul %114, %115, %cst_37 {dimension_numbers = #tpu.dot_dimension_numbers<[1], [0], [0], [1], [0, 0, 1, 1], [], []>} : vector<8x8xbf16>, vector<8x8xbf16>, vector<8x8xf32> -> vector<8x8xf32>
    %117 = arith.truncf %116 : vector<8x8xf32> to vector<8x8xbf16>
    %118 = vector.extract_strided_slice %28 {offsets = [24, 0], sizes = [8, 32], strides = [1, 1]} : vector<32x32xbf16> to vector<8x32xbf16>
    %cst_38 = arith.constant dense<0.000000e+00> : vector<8x32xf32>
    %119 = tpu.matmul %117, %118, %cst_38 {dimension_numbers = #tpu.dot_dimension_numbers<[1], [0], [0], [1], [0, 0, 1, 1], [], []>} : vector<8x8xbf16>, vector<8x32xbf16>, vector<8x32xf32> -> vector<8x32xf32>
    %120 = arith.addf %98, %119 : vector<8x32xf32>
    %121 = vector.extract_strided_slice %7 {offsets = [3, 0], sizes = [1, 32], strides = [1, 1]} : vector<15x32xf32> to vector<1x32xf32>
    %122 = vector.broadcast %121 : vector<1x32xf32> to vector<8x32xf32>
    %123 = arith.addf %120, %122 : vector<8x32xf32>
    %124 = arith.addf %3, %123 : vector<8x32xf32>
    %125 = vector.extract_strided_slice %7 {offsets = [9, 0], sizes = [1, 32], strides = [1, 1]} : vector<15x32xf32> to vector<1x32xf32>
    %126 = vector.extract_strided_slice %7 {offsets = [12, 0], sizes = [1, 32], strides = [1, 1]} : vector<15x32xf32> to vector<1x32xf32>
    %cst_39 = arith.constant dense<0.000000e+00> : vector<8xf32>
    %127 = vector.multi_reduction <add>, %124, %cst_39 [1] : vector<8x32xf32> to vector<8xf32>
    %128 = vector.shape_cast %127 : vector<8xf32> to vector<8x1xf32>
    %cst_40 = arith.constant 3.200000e+01 : f32
    %129 = vector.broadcast %cst_40 : f32 to vector<8x1xf32>
    %130 = arith.divf %128, %129 : vector<8x1xf32>
    %131 = vector.broadcast %130 : vector<8x1xf32> to vector<8x32xf32>
    %132 = arith.subf %124, %131 : vector<8x32xf32>
    %133 = arith.mulf %132, %132 : vector<8x32xf32>
    %cst_41 = arith.constant dense<0.000000e+00> : vector<8xf32>
    %134 = vector.multi_reduction <add>, %133, %cst_41 [1] : vector<8x32xf32> to vector<8xf32>
    %135 = vector.shape_cast %134 : vector<8xf32> to vector<8x1xf32>
    %cst_42 = arith.constant 3.200000e+01 : f32
    %136 = vector.broadcast %cst_42 : f32 to vector<8x1xf32>
    %137 = arith.divf %135, %136 : vector<8x1xf32>
    %138 = vector.broadcast %130 : vector<8x1xf32> to vector<8x32xf32>
    %139 = arith.subf %124, %138 : vector<8x32xf32>
    %cst_43 = arith.constant 9.99999974E-6 : f32
    %140 = vector.broadcast %cst_43 : f32 to vector<8x1xf32>
    %141 = arith.addf %137, %140 : vector<8x1xf32>
    %142 = math.rsqrt %141 : vector<8x1xf32>
    %143 = vector.broadcast %142 : vector<8x1xf32> to vector<8x32xf32>
    %144 = arith.mulf %139, %143 : vector<8x32xf32>
    %145 = vector.broadcast %125 : vector<1x32xf32> to vector<8x32xf32>
    %146 = arith.mulf %144, %145 : vector<8x32xf32>
    %147 = vector.broadcast %126 : vector<1x32xf32> to vector<8x32xf32>
    %148 = arith.addf %146, %147 : vector<8x32xf32>
    %c0_44 = arith.constant 0 : index
    %c0_45 = arith.constant 0 : index
    %c0_46 = arith.constant 0 : index
    %149 = vector.load %arg6[%c0_44, %c0_45, %c0_46] : memref<1x32x32xbf16, #tpu.memory_space<vmem>>, vector<1x32x32xbf16>
    %150 = vector.shape_cast %149 : vector<1x32x32xbf16> to vector<32x32xbf16>
    %151 = arith.truncf %148 : vector<8x32xf32> to vector<8x32xbf16>
    %cst_47 = arith.constant dense<0.000000e+00> : vector<8x32xf32>
    %152 = tpu.matmul %151, %150, %cst_47 {dimension_numbers = #tpu.dot_dimension_numbers<[1], [0], [0], [1], [0, 0, 1, 1], [], []>} : vector<8x32xbf16>, vector<32x32xbf16>, vector<8x32xf32> -> vector<8x32xf32>
    %153 = vector.extract_strided_slice %7 {offsets = [4, 0], sizes = [1, 32], strides = [1, 1]} : vector<15x32xf32> to vector<1x32xf32>
    %154 = vector.broadcast %153 : vector<1x32xf32> to vector<8x32xf32>
    %155 = arith.addf %152, %154 : vector<8x32xf32>
    %c0_48 = arith.constant 0 : index
    %c0_49 = arith.constant 0 : index
    %c0_50 = arith.constant 0 : index
    %156 = vector.load %arg7[%c0_48, %c0_49, %c0_50] : memref<1x32x64xbf16, #tpu.memory_space<vmem>>, vector<1x32x64xbf16>
    %157 = vector.shape_cast %156 : vector<1x32x64xbf16> to vector<32x64xbf16>
    %cst_51 = arith.constant dense<0.000000e+00> : vector<12x64xf32>
    %158 = tpu.matmul %5, %157, %cst_51 {dimension_numbers = #tpu.dot_dimension_numbers<[1], [0], [0], [1], [0, 0, 1, 1], [], []>} : vector<12x32xbf16>, vector<32x64xbf16>, vector<12x64xf32> -> vector<12x64xf32>
    %159 = vector.extract_strided_slice %158 {offsets = [0, 0], sizes = [12, 32], strides = [1, 1]} : vector<12x64xf32> to vector<12x32xf32>
    %160 = vector.extract_strided_slice %7 {offsets = [5, 0], sizes = [1, 32], strides = [1, 1]} : vector<15x32xf32> to vector<1x32xf32>
    %161 = vector.broadcast %160 : vector<1x32xf32> to vector<12x32xf32>
    %162 = arith.addf %159, %161 : vector<12x32xf32>
    %163 = vector.extract_strided_slice %158 {offsets = [0, 32], sizes = [12, 32], strides = [1, 1]} : vector<12x64xf32> to vector<12x32xf32>
    %164 = vector.extract_strided_slice %7 {offsets = [6, 0], sizes = [1, 32], strides = [1, 1]} : vector<15x32xf32> to vector<1x32xf32>
    %165 = vector.broadcast %164 : vector<1x32xf32> to vector<12x32xf32>
    %166 = arith.addf %163, %165 : vector<12x32xf32>
    %c0_52 = arith.constant 0 : index
    %c0_53 = arith.constant 0 : index
    %c0_54 = arith.constant 0 : index
    %167 = vector.load %arg8[%c0_52, %c0_53, %c0_54] : memref<1x32x32xbf16, #tpu.memory_space<vmem>>, vector<1x32x32xbf16>
    %168 = vector.shape_cast %167 : vector<1x32x32xbf16> to vector<32x32xbf16>
    %169 = arith.truncf %155 : vector<8x32xf32> to vector<8x32xbf16>
    %170 = arith.truncf %162 : vector<12x32xf32> to vector<12x32xbf16>
    %171 = arith.truncf %166 : vector<12x32xf32> to vector<12x32xbf16>
    %cst_55 = arith.constant 0.000000e+00 : f32
    %172 = vector.broadcast %cst_55 : f32 to vector<8x32xf32>
    %173 = vector.extract_strided_slice %169 {offsets = [0, 0], sizes = [8, 8], strides = [1, 1]} : vector<8x32xbf16> to vector<8x8xbf16>
    %174 = vector.extract_strided_slice %170 {offsets = [0, 0], sizes = [12, 8], strides = [1, 1]} : vector<12x32xbf16> to vector<12x8xbf16>
    %cst_56 = arith.constant dense<0.000000e+00> : vector<8x12xf32>
    %175 = tpu.matmul %173, %174, %cst_56 {dimension_numbers = #tpu.dot_dimension_numbers<[1], [1], [0], [0], [0, 0, 1, 0], [], []>} : vector<8x8xbf16>, vector<12x8xbf16>, vector<8x12xf32> -> vector<8x12xf32>
    %cst_57 = arith.constant dense<0xFF800000> : vector<8xf32>
    %176 = vector.multi_reduction <maximumf>, %175, %cst_57 [1] : vector<8x12xf32> to vector<8xf32>
    %177 = vector.shape_cast %176 : vector<8xf32> to vector<8x1xf32>
    %178 = vector.broadcast %177 : vector<8x1xf32> to vector<8x12xf32>
    %179 = arith.subf %175, %178 : vector<8x12xf32>
    %180 = math.exp %179 : vector<8x12xf32>
    %cst_58 = arith.constant dense<0.000000e+00> : vector<8xf32>
    %181 = vector.multi_reduction <add>, %180, %cst_58 [1] : vector<8x12xf32> to vector<8xf32>
    %182 = vector.shape_cast %181 : vector<8xf32> to vector<8x1xf32>
    %183 = tpu.reciprocal %182 {approx = true} : vector<8x1xf32> -> vector<8x1xf32>
    %184 = vector.broadcast %183 : vector<8x1xf32> to vector<8x12xf32>
    %185 = arith.mulf %180, %184 : vector<8x12xf32>
    %186 = arith.truncf %185 : vector<8x12xf32> to vector<8x12xbf16>
    %187 = vector.extract_strided_slice %171 {offsets = [0, 0], sizes = [12, 8], strides = [1, 1]} : vector<12x32xbf16> to vector<12x8xbf16>
    %cst_59 = arith.constant dense<0.000000e+00> : vector<8x8xf32>
    %188 = tpu.matmul %186, %187, %cst_59 {dimension_numbers = #tpu.dot_dimension_numbers<[1], [0], [0], [1], [0, 0, 1, 1], [], []>} : vector<8x12xbf16>, vector<12x8xbf16>, vector<8x8xf32> -> vector<8x8xf32>
    %189 = arith.truncf %188 : vector<8x8xf32> to vector<8x8xbf16>
    %190 = vector.extract_strided_slice %168 {offsets = [0, 0], sizes = [8, 32], strides = [1, 1]} : vector<32x32xbf16> to vector<8x32xbf16>
    %cst_60 = arith.constant dense<0.000000e+00> : vector<8x32xf32>
    %191 = tpu.matmul %189, %190, %cst_60 {dimension_numbers = #tpu.dot_dimension_numbers<[1], [0], [0], [1], [0, 0, 1, 1], [], []>} : vector<8x8xbf16>, vector<8x32xbf16>, vector<8x32xf32> -> vector<8x32xf32>
    %192 = arith.addf %172, %191 : vector<8x32xf32>
    %193 = vector.extract_strided_slice %169 {offsets = [0, 8], sizes = [8, 8], strides = [1, 1]} : vector<8x32xbf16> to vector<8x8xbf16>
    %194 = vector.extract_strided_slice %170 {offsets = [0, 8], sizes = [12, 8], strides = [1, 1]} : vector<12x32xbf16> to vector<12x8xbf16>
    %cst_61 = arith.constant dense<0.000000e+00> : vector<8x12xf32>
    %195 = tpu.matmul %193, %194, %cst_61 {dimension_numbers = #tpu.dot_dimension_numbers<[1], [1], [0], [0], [0, 0, 1, 0], [], []>} : vector<8x8xbf16>, vector<12x8xbf16>, vector<8x12xf32> -> vector<8x12xf32>
    %cst_62 = arith.constant dense<0xFF800000> : vector<8xf32>
    %196 = vector.multi_reduction <maximumf>, %195, %cst_62 [1] : vector<8x12xf32> to vector<8xf32>
    %197 = vector.shape_cast %196 : vector<8xf32> to vector<8x1xf32>
    %198 = vector.broadcast %197 : vector<8x1xf32> to vector<8x12xf32>
    %199 = arith.subf %195, %198 : vector<8x12xf32>
    %200 = math.exp %199 : vector<8x12xf32>
    %cst_63 = arith.constant dense<0.000000e+00> : vector<8xf32>
    %201 = vector.multi_reduction <add>, %200, %cst_63 [1] : vector<8x12xf32> to vector<8xf32>
    %202 = vector.shape_cast %201 : vector<8xf32> to vector<8x1xf32>
    %203 = tpu.reciprocal %202 {approx = true} : vector<8x1xf32> -> vector<8x1xf32>
    %204 = vector.broadcast %203 : vector<8x1xf32> to vector<8x12xf32>
    %205 = arith.mulf %200, %204 : vector<8x12xf32>
    %206 = arith.truncf %205 : vector<8x12xf32> to vector<8x12xbf16>
    %207 = vector.extract_strided_slice %171 {offsets = [0, 8], sizes = [12, 8], strides = [1, 1]} : vector<12x32xbf16> to vector<12x8xbf16>
    %cst_64 = arith.constant dense<0.000000e+00> : vector<8x8xf32>
    %208 = tpu.matmul %206, %207, %cst_64 {dimension_numbers = #tpu.dot_dimension_numbers<[1], [0], [0], [1], [0, 0, 1, 1], [], []>} : vector<8x12xbf16>, vector<12x8xbf16>, vector<8x8xf32> -> vector<8x8xf32>
    %209 = arith.truncf %208 : vector<8x8xf32> to vector<8x8xbf16>
    %210 = vector.extract_strided_slice %168 {offsets = [8, 0], sizes = [8, 32], strides = [1, 1]} : vector<32x32xbf16> to vector<8x32xbf16>
    %cst_65 = arith.constant dense<0.000000e+00> : vector<8x32xf32>
    %211 = tpu.matmul %209, %210, %cst_65 {dimension_numbers = #tpu.dot_dimension_numbers<[1], [0], [0], [1], [0, 0, 1, 1], [], []>} : vector<8x8xbf16>, vector<8x32xbf16>, vector<8x32xf32> -> vector<8x32xf32>
    %212 = arith.addf %192, %211 : vector<8x32xf32>
    %213 = vector.extract_strided_slice %169 {offsets = [0, 16], sizes = [8, 8], strides = [1, 1]} : vector<8x32xbf16> to vector<8x8xbf16>
    %214 = vector.extract_strided_slice %170 {offsets = [0, 16], sizes = [12, 8], strides = [1, 1]} : vector<12x32xbf16> to vector<12x8xbf16>
    %cst_66 = arith.constant dense<0.000000e+00> : vector<8x12xf32>
    %215 = tpu.matmul %213, %214, %cst_66 {dimension_numbers = #tpu.dot_dimension_numbers<[1], [1], [0], [0], [0, 0, 1, 0], [], []>} : vector<8x8xbf16>, vector<12x8xbf16>, vector<8x12xf32> -> vector<8x12xf32>
    %cst_67 = arith.constant dense<0xFF800000> : vector<8xf32>
    %216 = vector.multi_reduction <maximumf>, %215, %cst_67 [1] : vector<8x12xf32> to vector<8xf32>
    %217 = vector.shape_cast %216 : vector<8xf32> to vector<8x1xf32>
    %218 = vector.broadcast %217 : vector<8x1xf32> to vector<8x12xf32>
    %219 = arith.subf %215, %218 : vector<8x12xf32>
    %220 = math.exp %219 : vector<8x12xf32>
    %cst_68 = arith.constant dense<0.000000e+00> : vector<8xf32>
    %221 = vector.multi_reduction <add>, %220, %cst_68 [1] : vector<8x12xf32> to vector<8xf32>
    %222 = vector.shape_cast %221 : vector<8xf32> to vector<8x1xf32>
    %223 = tpu.reciprocal %222 {approx = true} : vector<8x1xf32> -> vector<8x1xf32>
    %224 = vector.broadcast %223 : vector<8x1xf32> to vector<8x12xf32>
    %225 = arith.mulf %220, %224 : vector<8x12xf32>
    %226 = arith.truncf %225 : vector<8x12xf32> to vector<8x12xbf16>
    %227 = vector.extract_strided_slice %171 {offsets = [0, 16], sizes = [12, 8], strides = [1, 1]} : vector<12x32xbf16> to vector<12x8xbf16>
    %cst_69 = arith.constant dense<0.000000e+00> : vector<8x8xf32>
    %228 = tpu.matmul %226, %227, %cst_69 {dimension_numbers = #tpu.dot_dimension_numbers<[1], [0], [0], [1], [0, 0, 1, 1], [], []>} : vector<8x12xbf16>, vector<12x8xbf16>, vector<8x8xf32> -> vector<8x8xf32>
    %229 = arith.truncf %228 : vector<8x8xf32> to vector<8x8xbf16>
    %230 = vector.extract_strided_slice %168 {offsets = [16, 0], sizes = [8, 32], strides = [1, 1]} : vector<32x32xbf16> to vector<8x32xbf16>
    %cst_70 = arith.constant dense<0.000000e+00> : vector<8x32xf32>
    %231 = tpu.matmul %229, %230, %cst_70 {dimension_numbers = #tpu.dot_dimension_numbers<[1], [0], [0], [1], [0, 0, 1, 1], [], []>} : vector<8x8xbf16>, vector<8x32xbf16>, vector<8x32xf32> -> vector<8x32xf32>
    %232 = arith.addf %212, %231 : vector<8x32xf32>
    %233 = vector.extract_strided_slice %169 {offsets = [0, 24], sizes = [8, 8], strides = [1, 1]} : vector<8x32xbf16> to vector<8x8xbf16>
    %234 = vector.extract_strided_slice %170 {offsets = [0, 24], sizes = [12, 8], strides = [1, 1]} : vector<12x32xbf16> to vector<12x8xbf16>
    %cst_71 = arith.constant dense<0.000000e+00> : vector<8x12xf32>
    %235 = tpu.matmul %233, %234, %cst_71 {dimension_numbers = #tpu.dot_dimension_numbers<[1], [1], [0], [0], [0, 0, 1, 0], [], []>} : vector<8x8xbf16>, vector<12x8xbf16>, vector<8x12xf32> -> vector<8x12xf32>
    %cst_72 = arith.constant dense<0xFF800000> : vector<8xf32>
    %236 = vector.multi_reduction <maximumf>, %235, %cst_72 [1] : vector<8x12xf32> to vector<8xf32>
    %237 = vector.shape_cast %236 : vector<8xf32> to vector<8x1xf32>
    %238 = vector.broadcast %237 : vector<8x1xf32> to vector<8x12xf32>
    %239 = arith.subf %235, %238 : vector<8x12xf32>
    %240 = math.exp %239 : vector<8x12xf32>
    %cst_73 = arith.constant dense<0.000000e+00> : vector<8xf32>
    %241 = vector.multi_reduction <add>, %240, %cst_73 [1] : vector<8x12xf32> to vector<8xf32>
    %242 = vector.shape_cast %241 : vector<8xf32> to vector<8x1xf32>
    %243 = tpu.reciprocal %242 {approx = true} : vector<8x1xf32> -> vector<8x1xf32>
    %244 = vector.broadcast %243 : vector<8x1xf32> to vector<8x12xf32>
    %245 = arith.mulf %240, %244 : vector<8x12xf32>
    %246 = arith.truncf %245 : vector<8x12xf32> to vector<8x12xbf16>
    %247 = vector.extract_strided_slice %171 {offsets = [0, 24], sizes = [12, 8], strides = [1, 1]} : vector<12x32xbf16> to vector<12x8xbf16>
    %cst_74 = arith.constant dense<0.000000e+00> : vector<8x8xf32>
    %248 = tpu.matmul %246, %247, %cst_74 {dimension_numbers = #tpu.dot_dimension_numbers<[1], [0], [0], [1], [0, 0, 1, 1], [], []>} : vector<8x12xbf16>, vector<12x8xbf16>, vector<8x8xf32> -> vector<8x8xf32>
    %249 = arith.truncf %248 : vector<8x8xf32> to vector<8x8xbf16>
    %250 = vector.extract_strided_slice %168 {offsets = [24, 0], sizes = [8, 32], strides = [1, 1]} : vector<32x32xbf16> to vector<8x32xbf16>
    %cst_75 = arith.constant dense<0.000000e+00> : vector<8x32xf32>
    %251 = tpu.matmul %249, %250, %cst_75 {dimension_numbers = #tpu.dot_dimension_numbers<[1], [0], [0], [1], [0, 0, 1, 1], [], []>} : vector<8x8xbf16>, vector<8x32xbf16>, vector<8x32xf32> -> vector<8x32xf32>
    %252 = arith.addf %232, %251 : vector<8x32xf32>
    %253 = vector.extract_strided_slice %7 {offsets = [7, 0], sizes = [1, 32], strides = [1, 1]} : vector<15x32xf32> to vector<1x32xf32>
    %254 = vector.broadcast %253 : vector<1x32xf32> to vector<8x32xf32>
    %255 = arith.addf %252, %254 : vector<8x32xf32>
    %256 = arith.addf %148, %255 : vector<8x32xf32>
    %257 = vector.extract_strided_slice %7 {offsets = [10, 0], sizes = [1, 32], strides = [1, 1]} : vector<15x32xf32> to vector<1x32xf32>
    %258 = vector.extract_strided_slice %7 {offsets = [13, 0], sizes = [1, 32], strides = [1, 1]} : vector<15x32xf32> to vector<1x32xf32>
    %cst_76 = arith.constant dense<0.000000e+00> : vector<8xf32>
    %259 = vector.multi_reduction <add>, %256, %cst_76 [1] : vector<8x32xf32> to vector<8xf32>
    %260 = vector.shape_cast %259 : vector<8xf32> to vector<8x1xf32>
    %cst_77 = arith.constant 3.200000e+01 : f32
    %261 = vector.broadcast %cst_77 : f32 to vector<8x1xf32>
    %262 = arith.divf %260, %261 : vector<8x1xf32>
    %263 = vector.broadcast %262 : vector<8x1xf32> to vector<8x32xf32>
    %264 = arith.subf %256, %263 : vector<8x32xf32>
    %265 = arith.mulf %264, %264 : vector<8x32xf32>
    %cst_78 = arith.constant dense<0.000000e+00> : vector<8xf32>
    %266 = vector.multi_reduction <add>, %265, %cst_78 [1] : vector<8x32xf32> to vector<8xf32>
    %267 = vector.shape_cast %266 : vector<8xf32> to vector<8x1xf32>
    %cst_79 = arith.constant 3.200000e+01 : f32
    %268 = vector.broadcast %cst_79 : f32 to vector<8x1xf32>
    %269 = arith.divf %267, %268 : vector<8x1xf32>
    %270 = vector.broadcast %262 : vector<8x1xf32> to vector<8x32xf32>
    %271 = arith.subf %256, %270 : vector<8x32xf32>
    %cst_80 = arith.constant 9.99999974E-6 : f32
    %272 = vector.broadcast %cst_80 : f32 to vector<8x1xf32>
    %273 = arith.addf %269, %272 : vector<8x1xf32>
    %274 = math.rsqrt %273 : vector<8x1xf32>
    %275 = vector.broadcast %274 : vector<8x1xf32> to vector<8x32xf32>
    %276 = arith.mulf %271, %275 : vector<8x32xf32>
    %277 = vector.broadcast %257 : vector<1x32xf32> to vector<8x32xf32>
    %278 = arith.mulf %276, %277 : vector<8x32xf32>
    %279 = vector.broadcast %258 : vector<1x32xf32> to vector<8x32xf32>
    %280 = arith.addf %278, %279 : vector<8x32xf32>
    %c0_81 = arith.constant 0 : index
    %c0_82 = arith.constant 0 : index
    %c0_83 = arith.constant 0 : index
    %281 = vector.load %arg9[%c0_81, %c0_82, %c0_83] : memref<1x32x64xbf16, #tpu.memory_space<vmem>>, vector<1x32x64xbf16>
    %282 = vector.shape_cast %281 : vector<1x32x64xbf16> to vector<32x64xbf16>
    %283 = arith.truncf %280 : vector<8x32xf32> to vector<8x32xbf16>
    %cst_84 = arith.constant dense<0.000000e+00> : vector<8x64xf32>
    %284 = tpu.matmul %283, %282, %cst_84 {dimension_numbers = #tpu.dot_dimension_numbers<[1], [0], [0], [1], [0, 0, 1, 1], [], []>} : vector<8x32xbf16>, vector<32x64xbf16>, vector<8x64xf32> -> vector<8x64xf32>
    %c0_85 = arith.constant 0 : index
    %c0_86 = arith.constant 0 : index
    %c0_87 = arith.constant 0 : index
    %285 = vector.load %arg12[%c0_85, %c0_86, %c0_87] : memref<1x1x64xf32, #tpu.memory_space<vmem>>, vector<1x1x64xf32>
    %286 = vector.shape_cast %285 : vector<1x1x64xf32> to vector<1x64xf32>
    %287 = vector.broadcast %286 : vector<1x64xf32> to vector<8x64xf32>
    %288 = arith.addf %284, %287 : vector<8x64xf32>
    %cst_88 = arith.constant 0.000000e+00 : f32
    %289 = vector.broadcast %cst_88 : f32 to vector<8x64xf32>
    %290 = arith.maximumf %288, %289 : vector<8x64xf32>
    %c0_89 = arith.constant 0 : index
    %c0_90 = arith.constant 0 : index
    %c0_91 = arith.constant 0 : index
    %291 = vector.load %arg10[%c0_89, %c0_90, %c0_91] : memref<1x64x32xbf16, #tpu.memory_space<vmem>>, vector<1x64x32xbf16>
    %292 = vector.shape_cast %291 : vector<1x64x32xbf16> to vector<64x32xbf16>
    %293 = arith.truncf %290 : vector<8x64xf32> to vector<8x64xbf16>
    %cst_92 = arith.constant dense<0.000000e+00> : vector<8x32xf32>
    %294 = tpu.matmul %293, %292, %cst_92 {dimension_numbers = #tpu.dot_dimension_numbers<[1], [0], [0], [1], [0, 0, 1, 1], [], []>} : vector<8x64xbf16>, vector<64x32xbf16>, vector<8x32xf32> -> vector<8x32xf32>
    %295 = vector.extract_strided_slice %7 {offsets = [8, 0], sizes = [1, 32], strides = [1, 1]} : vector<15x32xf32> to vector<1x32xf32>
    %296 = vector.broadcast %295 : vector<1x32xf32> to vector<8x32xf32>
    %297 = arith.addf %294, %296 : vector<8x32xf32>
    %298 = arith.addf %280, %297 : vector<8x32xf32>
    %299 = vector.extract_strided_slice %7 {offsets = [11, 0], sizes = [1, 32], strides = [1, 1]} : vector<15x32xf32> to vector<1x32xf32>
    %300 = vector.extract_strided_slice %7 {offsets = [14, 0], sizes = [1, 32], strides = [1, 1]} : vector<15x32xf32> to vector<1x32xf32>
    %cst_93 = arith.constant dense<0.000000e+00> : vector<8xf32>
    %301 = vector.multi_reduction <add>, %298, %cst_93 [1] : vector<8x32xf32> to vector<8xf32>
    %302 = vector.shape_cast %301 : vector<8xf32> to vector<8x1xf32>
    %cst_94 = arith.constant 3.200000e+01 : f32
    %303 = vector.broadcast %cst_94 : f32 to vector<8x1xf32>
    %304 = arith.divf %302, %303 : vector<8x1xf32>
    %305 = vector.broadcast %304 : vector<8x1xf32> to vector<8x32xf32>
    %306 = arith.subf %298, %305 : vector<8x32xf32>
    %307 = arith.mulf %306, %306 : vector<8x32xf32>
    %cst_95 = arith.constant dense<0.000000e+00> : vector<8xf32>
    %308 = vector.multi_reduction <add>, %307, %cst_95 [1] : vector<8x32xf32> to vector<8xf32>
    %309 = vector.shape_cast %308 : vector<8xf32> to vector<8x1xf32>
    %cst_96 = arith.constant 3.200000e+01 : f32
    %310 = vector.broadcast %cst_96 : f32 to vector<8x1xf32>
    %311 = arith.divf %309, %310 : vector<8x1xf32>
    %312 = vector.broadcast %304 : vector<8x1xf32> to vector<8x32xf32>
    %313 = arith.subf %298, %312 : vector<8x32xf32>
    %cst_97 = arith.constant 9.99999974E-6 : f32
    %314 = vector.broadcast %cst_97 : f32 to vector<8x1xf32>
    %315 = arith.addf %311, %314 : vector<8x1xf32>
    %316 = math.rsqrt %315 : vector<8x1xf32>
    %317 = vector.broadcast %316 : vector<8x1xf32> to vector<8x32xf32>
    %318 = arith.mulf %313, %317 : vector<8x32xf32>
    %319 = vector.broadcast %299 : vector<1x32xf32> to vector<8x32xf32>
    %320 = arith.mulf %318, %319 : vector<8x32xf32>
    %321 = vector.broadcast %300 : vector<1x32xf32> to vector<8x32xf32>
    %322 = arith.addf %320, %321 : vector<8x32xf32>
    %c0_98 = arith.constant 0 : index
    %c0_99 = arith.constant 0 : index
    %323 = vector.load %arg16[%c0_98, %c0_99] : memref<8x32xf32, #tpu.memory_space<vmem>>, vector<8x32xf32>
    tpu.vector_store %arg16[%c0_98, %c0_99], %322 {strides = array<i32>} : memref<8x32xf32, #tpu.memory_space<vmem>>, vector<8x32xf32>,
    %c1_i32 = arith.constant 1 : i32
    %324 = arith.cmpi eq, %arg1, %c1_i32 : i32
    %325 = arith.extui %324 : i1 to i32
    %c0_i32_100 = arith.constant 0 : i32
    %326 = arith.cmpi ne, %325, %c0_i32_100 : i32
    scf.if %326 {
      %c0_101 = arith.constant 0 : index
      %c0_102 = arith.constant 0 : index
      %327 = vector.load %arg13[%c0_101, %c0_102] : memref<1x32xf32, #tpu.memory_space<vmem>>, vector<1x32xf32>
      %c0_103 = arith.constant 0 : index
      %c0_104 = arith.constant 0 : index
      %328 = vector.load %arg14[%c0_103, %c0_104] : memref<1x32xf32, #tpu.memory_space<vmem>>, vector<1x32xf32>
      %cst_105 = arith.constant dense<0.000000e+00> : vector<8xf32>
      %329 = vector.multi_reduction <add>, %322, %cst_105 [1] : vector<8x32xf32> to vector<8xf32>
      %330 = vector.shape_cast %329 : vector<8xf32> to vector<8x1xf32>
      %cst_106 = arith.constant 3.200000e+01 : f32
      %331 = vector.broadcast %cst_106 : f32 to vector<8x1xf32>
      %332 = arith.divf %330, %331 : vector<8x1xf32>
      %333 = vector.broadcast %332 : vector<8x1xf32> to vector<8x32xf32>
      %334 = arith.subf %322, %333 : vector<8x32xf32>
      %335 = arith.mulf %334, %334 : vector<8x32xf32>
      %cst_107 = arith.constant dense<0.000000e+00> : vector<8xf32>
      %336 = vector.multi_reduction <add>, %335, %cst_107 [1] : vector<8x32xf32> to vector<8xf32>
      %337 = vector.shape_cast %336 : vector<8xf32> to vector<8x1xf32>
      %cst_108 = arith.constant 3.200000e+01 : f32
      %338 = vector.broadcast %cst_108 : f32 to vector<8x1xf32>
      %339 = arith.divf %337, %338 : vector<8x1xf32>
      %340 = vector.broadcast %332 : vector<8x1xf32> to vector<8x32xf32>
      %341 = arith.subf %322, %340 : vector<8x32xf32>
      %cst_109 = arith.constant 9.99999974E-6 : f32
      %342 = vector.broadcast %cst_109 : f32 to vector<8x1xf32>
      %343 = arith.addf %339, %342 : vector<8x1xf32>
      %344 = math.rsqrt %343 : vector<8x1xf32>
      %345 = vector.broadcast %344 : vector<8x1xf32> to vector<8x32xf32>
      %346 = arith.mulf %341, %345 : vector<8x32xf32>
      %347 = vector.broadcast %327 : vector<1x32xf32> to vector<8x32xf32>
      %348 = arith.mulf %346, %347 : vector<8x32xf32>
      %349 = vector.broadcast %328 : vector<1x32xf32> to vector<8x32xf32>
      %350 = arith.addf %348, %349 : vector<8x32xf32>
      %351 = vector.shape_cast %350 : vector<8x32xf32> to vector<1x8x32xf32>
      %c0_110 = arith.constant 0 : index
      %c0_111 = arith.constant 0 : index
      %c0_112 = arith.constant 0 : index
      %352 = vector.load %arg15[%c0_110, %c0_111, %c0_112] : memref<1x8x32xf32, #tpu.memory_space<vmem>>, vector<1x8x32xf32>
      tpu.vector_store %arg15[%c0_110, %c0_111, %c0_112], %351 {strides = array<i32>} : memref<1x8x32xf32, #tpu.memory_space<vmem>>, vector<1x8x32xf32>,
    } else {
    }
    return
  }
  func.func @transform_0(%arg0: i32, %arg1: i32) -> (i32, i32, i32) {
    %c0_i32 = arith.constant 0 : i32
    %c0_i32_0 = arith.constant 0 : i32
    %c0_i32_1 = arith.constant 0 : i32
    return %arg0, %c0_i32, %c0_i32_0 : i32, i32, i32
  }
  func.func @transform_1(%arg0: i32, %arg1: i32) -> (i32, i32, i32) {
    %c0_i32 = arith.constant 0 : i32
    %c0_i32_0 = arith.constant 0 : i32
    %c0_i32_1 = arith.constant 0 : i32
    return %arg0, %c0_i32, %c0_i32_0 : i32, i32, i32
  }
  func.func @transform_2(%arg0: i32, %arg1: i32) -> (i32, i32, i32) {
    %c0_i32 = arith.constant 0 : i32
    %c0_i32_0 = arith.constant 0 : i32
    %c0_i32_1 = arith.constant 0 : i32
    return %arg1, %c0_i32, %c0_i32_0 : i32, i32, i32
  }
  func.func @transform_3(%arg0: i32, %arg1: i32) -> (i32, i32, i32) {
    %c0_i32 = arith.constant 0 : i32
    %c0_i32_0 = arith.constant 0 : i32
    %c0_i32_1 = arith.constant 0 : i32
    return %arg1, %c0_i32, %c0_i32_0 : i32, i32, i32
  }
  func.func @transform_4(%arg0: i32, %arg1: i32) -> (i32, i32, i32) {
    %c0_i32 = arith.constant 0 : i32
    %c0_i32_0 = arith.constant 0 : i32
    %c0_i32_1 = arith.constant 0 : i32
    return %arg1, %c0_i32, %c0_i32_0 : i32, i32, i32
  }
  func.func @transform_5(%arg0: i32, %arg1: i32) -> (i32, i32, i32) {
    %c0_i32 = arith.constant 0 : i32
    %c0_i32_0 = arith.constant 0 : i32
    %c0_i32_1 = arith.constant 0 : i32
    return %arg1, %c0_i32, %c0_i32_0 : i32, i32, i32
  }
  func.func @transform_6(%arg0: i32, %arg1: i32) -> (i32, i32, i32) {
    %c0_i32 = arith.constant 0 : i32
    %c0_i32_0 = arith.constant 0 : i32
    %c0_i32_1 = arith.constant 0 : i32
    return %arg1, %c0_i32, %c0_i32_0 : i32, i32, i32
  }
  func.func @transform_7(%arg0: i32, %arg1: i32) -> (i32, i32, i32) {
    %c0_i32 = arith.constant 0 : i32
    %c0_i32_0 = arith.constant 0 : i32
    %c0_i32_1 = arith.constant 0 : i32
    return %arg1, %c0_i32, %c0_i32_0 : i32, i32, i32
  }
  func.func @transform_8(%arg0: i32, %arg1: i32) -> (i32, i32, i32) {
    %c0_i32 = arith.constant 0 : i32
    %c0_i32_0 = arith.constant 0 : i32
    %c0_i32_1 = arith.constant 0 : i32
    return %arg1, %c0_i32, %c0_i32_0 : i32, i32, i32
  }
  func.func @transform_9(%arg0: i32, %arg1: i32) -> (i32, i32, i32) {
    %c0_i32 = arith.constant 0 : i32
    %c0_i32_0 = arith.constant 0 : i32
    %c0_i32_1 = arith.constant 0 : i32
    return %arg1, %c0_i32, %c0_i32_0 : i32, i32, i32
  }
  func.func @transform_10(%arg0: i32, %arg1: i32) -> (i32, i32, i32) {
    %c0_i32 = arith.constant 0 : i32
    %c0_i32_0 = arith.constant 0 : i32
    %c0_i32_1 = arith.constant 0 : i32
    return %arg1, %c0_i32, %c0_i32_0 : i32, i32, i32
  }
  func.func @transform_11(%arg0: i32, %arg1: i32) -> (i32, i32) {
    %c0_i32 = arith.constant 0 : i32
    %c0_i32_0 = arith.constant 0 : i32
    %c0_i32_1 = arith.constant 0 : i32
    return %c0_i32, %c0_i32_0 : i32, i32
  }
  func.func @transform_12(%arg0: i32, %arg1: i32) -> (i32, i32) {
    %c0_i32 = arith.constant 0 : i32
    %c0_i32_0 = arith.constant 0 : i32
    %c0_i32_1 = arith.constant 0 : i32
    return %c0_i32, %c0_i32_0 : i32, i32
  }
  func.func @transform_13(%arg0: i32, %arg1: i32) -> (i32, i32, i32) {
    %c0_i32 = arith.constant 0 : i32
    %c0_i32_0 = arith.constant 0 : i32
    %c0_i32_1 = arith.constant 0 : i32
    return %arg0, %c0_i32, %c0_i32_0 : i32, i32, i32
  }
}

</mosaic_0001>

<bundles_post_ra>
// kernel: transformer_decoder.1
= control target key start
LH: loop header
LB: loop body
LE: loop exit
PB: predicated region body
PF: predicated region fallthrough
CT: control target
= control target key end

     0   :  { %s3071_s0 = inlined_call_operand.hbm [shape: f32[2,8,32], index: 0, kind: input, shape index: {}]   ;;  %s3072_s1 = inlined_call_operand.vmem [shape: bf16[2,12,32], index: 1, kind: input, shape index: {}]   ;;  %s3073_s2 = inlined_call_operand.vmem [shape: bf16[2,32,96], index: 2, kind: input, shape index: {}]   ;;  %s3074_s3 = inlined_call_operand.vmem [shape: bf16[2,32,32], index: 3, kind: input, shape index: {}]   ;;  %s3075_s4 = inlined_call_operand.vmem [shape: bf16[2,32,32], index: 4, kind: input, shape index: {}]   ;;  %s3076_s5 = inlined_call_operand.vmem [shape: bf16[2,32,64], index: 5, kind: input, shape index: {}]   ;;  %s3077_s6 = inlined_call_operand.vmem [shape: bf16[2,32,32], index: 6, kind: input, shape index: {}]   ;;  %s3078_s7 = inlined_call_operand.hbm [shape: bf16[2,32,64], index: 7, kind: input, shape index: {}]   ;;  %s3079_s8 = inlined_call_operand.vmem [shape: bf16[2,64,32], index: 8, kind: input, shape index: {}]   ;;  %s3080_s9 = inlined_call_operand.vmem [shape: f32[2,15,32], index: 9, kind: input, shape index: {}]   ;;  %s3081_s10 = inlined_call_operand.hbm [shape: f32[2,1,64], index: 10, kind: input, shape index: {}]   ;;  %s3082_s11 = inlined_call_operand.vmem [shape: f32[1,32], index: 11, kind: input, shape index: {}]   ;;  %s3083_s12 = inlined_call_operand.vmem [shape: f32[1,32], index: 12, kind: input, shape index: {}]   ;;  %s3084_s13 = inlined_call_operand.hbm [shape: f32[2,8,32], index: 13, kind: output, shape index: {}]  }
   0x1   :  { %3103 = sst [smem:[#allocation28_spill]] %s3071_s0 }
   0x2   :  { %3104 = sst [smem:[#allocation29_spill]] %s3072_s1 }
   0x3   :  { %3105 = sst [smem:[#allocation30_spill]] %s3073_s2 }
   0x4   :  { %3106 = sst [smem:[#allocation31_spill]] %s3074_s3 }
   0x5   :  { %3107 = sst [smem:[#allocation32_spill]] %s3075_s4 }
   0x6   :  { %3108 = sst [smem:[#allocation33_spill]] %s3076_s5 }
   0x7   :  { %3109 = sst [smem:[#allocation34_spill]] %s3077_s6 }
   0x8   :  { %3110 = sst [smem:[#allocation35_spill]] %s3078_s7 }
   0x9   :  { %3111 = sst [smem:[#allocation36_spill]] %s3079_s8 }
   0xa   :  { %3112 = sst [smem:[#allocation37_spill]] %s3080_s9 }
   0xb   :  { %3113 = sst [smem:[#allocation38_spill]] %s3081_s10 }
   0xc   :  { %3114 = sst [smem:[#allocation39_spill]] %s3082_s11 }
   0xd   :  { %3115 = sst [smem:[#allocation40_spill]] %s3083_s12 }
   0xe   :  { %3116 = sst [smem:[#allocation41_spill]] %s3084_s13 }
   0xf   :  { %18 = vsyncpa [#allocation4], 0 }
  0x10   :  { %20 = vsyncpa [#allocation4 + $0x1], 0 }
  0x11   :  { %21 = vsyncpa [#allocation7], 0 }
  0x12   :  { %23 = vsyncpa [#allocation7 + $0x1], 0 }
  0x13   :  { %24 = vsyncpa [#allocation5], 0 }
  0x14   :  { %26 = vsyncpa [#allocation5 + $0x1], 0  ;;  %s2568_s25 = smov 0   ;;  %s2570_s26 = smov 0  }
  0x15   :  { %s2572_s27 = smov 0   ;;  %s2574_s28 = smov 0  }
  0x16   :  { %s2576_s29 = smov 0   ;;  %s2578_s30 = smov 0  }
  0x17   :  { %s2580_s14 = smov 0   ;;  %s2582_s15 = smov 0  }
  0x18   :  { %s2584_s16 = smov 0   ;;  %s2586_s17 = smov 0  }
  0x19   :  { %s2588_s18 = smov 0  }
  0x1a LB: > { %3117 = sst [smem:[#allocation13_spill]] %s2445_s26  ;;  %p59_p0 = scmp.eq.s32.totalorder %s2481_s18, 0  ;;  %s2481_s18 = sphi %s2588_s18, %s32_s18   ;;  %s2477_s17 = sphi %s2586_s17, %s3175_s17   ;;  %s2473_s16 = sphi %s2584_s16, %s3174_s16   ;;  %s2469_s15 = sphi %s2582_s15, %s3173_s15   ;;  %s2465_s14 = sphi %s2580_s14, %s3172_s14   ;;  %s2461_s30 = sphi %s2578_s30, %s3171_s30   ;;  %s2457_s29 = sphi %s2576_s29, %s3170_s29   ;;  %s2453_s28 = sphi %s2574_s28, %s3169_s28   ;;  %s2449_s27 = sphi %s2572_s27, %s3168_s27   ;;  %s2445_s26 = sphi %s2570_s26, %s3167_s26   ;;  %s2441_s25 = sphi %s2568_s25, %s3166_s25  }
  0x1b   : > { %3118 = sst [smem:[#allocation14_spill]] %s2449_s27  ;;  %p240_p1 = scmp.ne.s32.totalorder %s2449_s27, %s2445_s26 }
  0x1c   : > { %3119 = sst [smem:[#allocation15_spill]] %s2453_s28  ;;  %p246_p2 = scmp.ne.s32.totalorder %s2445_s26, %s2441_s25 }
  0x1d   : > { %3120 = sst [smem:[#allocation16_spill]] %s2457_s29  ;;  %p242_p3 = por %p240_p1, %p59_p0 }
  0x1e   : > { %3121 = sst [smem:[#allocation17_spill]] %s2461_s30  ;;  %p3088_p4 = scmp.lt.s32.totalorder %s2481_s18, 4 }
  0x1f   : > { %3122 = sst [smem:[#allocation18_spill]] %s2465_s14  ;;  %s489_s21 = sand.u32 1, %s2481_s18  }
  0x20   : > { %3123 = sst [smem:[#allocation19_spill]] %s2473_s16  ;;  %s3086_s22 = sand.u32 1, %s2449_s27  }
  0x21   : > { %3124 = sst [smem:[#allocation20_spill]] %s2477_s17  ;;  %s1961_s23 = sshll.u32 %s3086_s22, 4 }
  0x22   : > { %3125 = sst [smem:[#allocation21_spill]] %s2481_s18  ;;  %s2071_s24 = sshll.u32 %s2473_s16, 4 }
  0x23   : > { %s3126_s7 = sld [smem:[#allocation35_spill]]  ;;  %s493_s20 = scalar_lea.vmem [#allocation6], %s1961_s23 }
  0x24   : > { %s501_s11 = sshll.u32 %s493_s20, 4  ;;  %p2643_p5 = pnand %p3088_p4, %p242_p3  ;;  %s502_s11 = int_to_ptr.vmem [resolvable:$true] %s501_s11 }
  0x25   : > { %p1964_p6 = scmp.ge.s32.totalorder %s2481_s18, 1  ;;  %s2648_s12 = scalar_lea.sflag [#allocation7], %s489_s21 }
  0x26   : > { %s2483_s13 = smov 64   ;;  %p542_p7 = scmp.lt.s32.totalorder %s2481_s18, 5 }
  0x27   : > { %s2659_s23 = sadd.s32 4294967295, %s2481_s18   ;;  %s3129_s21 = sadd.s32 1, %s2473_s16 }
  0x28   : > { %p2654_p8 = pnand %p1964_p6, %p542_p7  ;;  %p42_p9 = scmp.ge.s32.totalorder %s3129_s21, 2 }
  0x29   : > { %s498_s19 = scalar_lea.hbm %s3126_s7, %s2071_s24  ;;  %s1956_s24 = sadd.s32 4294967294, %s2481_s18  }
  0x2a   : > { %s499_s9 = sshll.u32 %s498_s19, 4  ;;  %s2484_s19 = smov 4   ;;  %s500_s9 = int_to_ptr.hbm [resolvable:$true] %s499_s9 }
  0x2b   : > { %2107 = dma.hbm_to_vmem [thread:$0]  (!%p2643_p5), %s500_s9, 256, %s502_s11, %s2648_s12, %s2483_s13, %s2483_s13, %s2484_s19  }
  0x2c   : > { %s44_s7 = sadd.s32 1, %s2477_s17  ;;  %s51_s8 = sadd.s32 1, %s2461_s30 }
  0x2d   : > { %p58_p10 = scmp.ne.s32.totalorder %s2461_s30, %s2457_s29  ;;  %s3130_s9 = smov %s3129_s21 }
  0x2e   : > { %s3177_s9 = smov (%p42_p9, %s3130_s9), 0  ;;  %s3179_s7 = smov (!%p42_p9, %s44_s7), %s2477_s17 }
  0x2f   : > { %3131 = sst [smem:[#allocation22_spill]] %s3177_s9  ;;  %p2678_p11 = por %p59_p0, %p58_p10 }
  0x30   : > { %p64_p12 = scmp.ne.s32.totalorder %s2457_s29, %s2453_s28  ;;  %p46_p13 = scmp.ge.s32.totalorder %s3179_s7, 2 }
  0x31   : > { %p65_p1 = scmp.eq.s32.totalorder %s2659_s23, 0  ;;  %s230_s13 = ssub.s32 %s2473_s16, %s3177_s9 }
  0x32   : > { %p390_p3 = scmp.eq.s32.totalorder %s2659_s23, 3  ;;  %s3181_s7 = smov (%p46_p13, %s3179_s7), 0 }
  0x33   : > { %3133 = sst [smem:[#allocation23_spill]] %s3181_s7  ;;  %p2693_p6 = por %p65_p1, %p64_p12 }
  0x34   : > { %p231_p0 = scmp.eq.s32.totalorder %s230_s13, 0  ;;  %s48_s21 = ssub.s32 %s2477_s17, %s3181_s7 }
  0x35   : > { %p2702_p7 = por %p246_p2, %p65_p1  ;;  %p49_p9 = scmp.eq.s32.totalorder %s48_s21, 0 }
  0x36   : > { %p2709_p13 = por %p390_p3, %p58_p10  ;;  %s3138_s5 = sadd.s32 1, %s2449_s27 }
  0x37   : > { %s2716_s4 = scalar_select %p231_p0, %s2449_s27, %s3138_s5  }
  0x38   : > { %s3136_s9 = scalar_select %p2709_p13, 1, 0 }
  0x39   : > { %3139 = sst [smem:[#allocation25_spill]] %s2716_s4  ;;  %p396_p4 = scmp.eq.s32.totalorder %s1956_s24, 3 }
  0x3a   : > { %3137 = sst [smem:[#allocation24_spill]] %s3136_s9  ;;  %s422_s25 = sand.u32 1, %s2461_s30  }
  0x3b   : > { %s2719_s3 = scalar_select %p49_p9, %s2461_s30, %s51_s8  }
  0x3c   : > { %s1959_s13 = sshll.u32 %s422_s25, 3  ;;  %p2725_p2 = por %p396_p4, %p64_p12 }
  0x3d   : > { %3140 = sst [smem:[#allocation26_spill]] %s2719_s3  ;;  %s1960_s21 = sshll.u32 %s2477_s17, 3 }
  0x3e   : > { %s3141_s7 = scalar_select %p2725_p2, 1, 0 }
  0x3f   : > { %s426_s2 = scalar_lea.vmem [#allocation3], %s1959_s13  ;;  %s3143_s0 = sld [smem:[#allocation28_spill]] }
  0x40   : > { %3142 = sst [smem:[#allocation27_spill]] %s3141_s7  ;;  %s434_s1 = sshll.u32 %s426_s2, 4  ;;  %s435_s1 = int_to_ptr.vmem [resolvable:$true] %s434_s1 }
  0x41   : > { %p3144_p10 = scmp.lt.s32.totalorder %s2481_s18, 4  ;;  %s3145_s10 = sld [smem:[#allocation38_spill]] }
  0x42   : > { %s423_s4 = scalar_lea.sflag [#allocation4], %s422_s25  ;;  %s3146_s7 = sand.u32 1, %s2449_s27  }
  0x43   : > { %p2102_p1 = pnand %p3144_p10, %p2678_p11  ;;  %s530_s13 = scalar_lea.vmem [#allocation8], %s3146_s7 }
  0x44   : > { %s537_s2 = sshll.u32 %s530_s13, 4  ;;  %s2749_s14 = sand.u32 (!%p2654_p8), 1, %s2457_s29   ;;  %s538_s2 = int_to_ptr.vmem [resolvable:$true] %s537_s2 }
  0x45   : > { %s430_s5 = scalar_lea.hbm %s3143_s0, %s1960_s21  ;;  %s1965_s3 = sshll.u32 (!%p2654_p8), %s2749_s14, 3 }
  0x46   : > { %s432_s8 = sshll.u32 %s430_s5, 4  ;;  %546 = sbr.rel (%p2654_p8) target bundleno = 4262 (0x10a6), region = 72  ;;  %s433_s8 = int_to_ptr.hbm [resolvable:$true] %s432_s8 }
  0x47   : > { %s533_s30 = scalar_lea.hbm %s3145_s10, %s2473_s16  ;;  %s549_s9 = scalar_lea.sflag (!%p2654_p8), [#allocation4], %s2749_s14 }
  0x48   : > { %2104 = dma.hbm_to_vmem [thread:$0]  (!%p2102_p1), %s433_s8, 128, %s435_s1, %s423_s4  }
  0x49   : > { %s535_s17 = sshll.u32 %s533_s30, 4  ;;  %s552_s1 = scalar_lea.vmem (!%p2654_p8), [#allocation3], %s1965_s3  ;;  %s536_s17 = int_to_ptr.hbm [resolvable:$true] %s535_s17 }
  0x4a   : > { %2110 = dma.hbm_to_vmem [thread:$0]  (!%p2643_p5), %s536_s17, 16, %s538_s2, %s2648_s12  }
  0x4b   : > { %2428 = dma.done.wait (%p2693_p6), %s549_s9, 128  }
  0x4c   : > { %2430 = vsyncadd (%p2693_p6), %s549_s9, 4294967168  ;;  %s558_s4 = sand.u32 1, %s2659_s23   ;;  %s560_s7 = sand.u32 1, %s2445_s26  }
  0x4d   : > { %s2759_s30 = sshll.u32 %s560_s7, 4  ;;  %s559_s17 = scalar_lea.sflag [#allocation7], %s558_s4 }
  0x4e   : > { %2432 = dma.done.wait (%p2702_p7), %s559_s17, 272  }
  0x4f   : > { %2434 = vsyncadd (%p2702_p7), %s559_s17, 4294967024  ;;  %s3147_s12 = sld [smem:[#allocation18_spill]]  ;;  %p664_p4 = scmp.lt.s32.totalorder %s2469_s15, 1 }
  0x50   : > { %s3148_s21 = sld [smem:[#allocation29_spill]]  ;;  %s2808_s18 = scalar_lea.vmem [#allocation8], %s560_s7 }
  0x51   : > { %s665_s20 = scalar_select %p664_p4, %s2469_s15, 1 }
  0x52   : > { %s3149_s2 = sld [smem:[#allocation30_spill]]  ;;  %s2810_s27 = scalar_lea.vmem [#allocation9], %s1965_s3 }
  0x53   : > { %s2072_s23 = sshll.u32 %s665_s20, 3  ;;  %s3150_s17 = sld [smem:[#allocation31_spill]] }
  0x54   : > { %s3151_s16 = sld [smem:[#allocation32_spill]] }
  0x55   : > { %p669_p5 = scmp.lt.s32.totalorder %s3147_s12, 1  ;;  %s3152_s19 = sld [smem:[#allocation33_spill]] }
  0x56   : > { %s2773_s5 = scalar_lea.vmem %s3148_s21, %s2072_s23  ;;  %s3153_s26 = sld [smem:[#allocation34_spill]] }
  0x57   : > { %s670_s11 = scalar_select %p669_p5, %s3147_s12, 1 }
  0x58   : > { %s3154_s4 = sld [smem:[#allocation36_spill]]  ;;  %p1984_p8 = scmp.ne.s32.totalorder %s3147_s12, 0 }
  0x59   : > { %s2073_s8 = sshll.u32 %s670_s11, 4  ;;  %s2078_s13 = sshll.u32 %s670_s11, 5 }
  0x5a   : > { %s673_s6 = scalar_lea.vmem %s3149_s2, %s2073_s8  ;;  %s2781_s22 = scalar_lea.vmem %s3150_s17, %s2073_s8 }
  0x5b   : > { %s2786_s29 = scalar_lea.vmem %s3151_s16, %s2073_s8  ;;  %s2791_s23 = scalar_lea.vmem %s3152_s19, %s2073_s8 }
  0x5c   : > { %s2796_s24 = scalar_lea.vmem %s3153_s26, %s2073_s8  ;;  %s3155_s10 = sld [smem:[#allocation37_spill]] }
  0x5e   : > { %s2801_s17 = scalar_lea.vmem %s3154_s4, %s2078_s13  ;;  %708 = sbr.rel (%p1984_p8) target bundleno = 101 (0x65), region = 88 }
  0x62   : > { %s2806_s16 = scalar_lea.vmem %s3155_s10, %s2073_s8 }
  0x63   : > { %v709_v0 = vld [vmem:[%s552_s1] sm:$0xff]  ;;  %vm710_vm0 = vcmask 261120  }
  0x64   : > { %711 = vst.msk [vmem:[#allocation2] sm:$0xff] %vm710_vm0, %v709_v0 }
  0x65 PF: > { %v2082_v1 = vld [vmem:[%s673_s6 + $0x8] sm:$0xff]  ;;  %v2814_v2 = vld [vmem:[%s2806_s16] sm:$0xff]  ;;  %s2485_s26 = smov 32   ;;  %vm739_vm1 = vcmask 261120   ;;  %s2486_s28 = smov 96   ;;  %vm782_vm2 = vcmask 64512   ;;  %v717_v26 = vlaneseq }
  0x66   : > { %749 = vmatpush.bf16.msra.mxu0 %v2082_v1  ;;  %v2081_v3 = vld [vmem:[%s673_s6] sm:$0xff]  ;;  %v758_v5 = vperm.slane %v2814_v2, 1  ;;  %v756_v12 = vperm.slane %v2814_v2, 0  ;;  %s2487_s3 = smov 88   ;;  %s2488_s1 = smov 120   ;;  %v764_v35 = vperm.slane %v2814_v2, 2 }
  0x67   : > { %s2489_s7 = smov 80   ;;  %s2490_s12 = smov 104   ;;  %v2834_v27 = vshrl.u32 %v717_v26, 7  ;;  %v2836_v28 = vand.u32 127, %v717_v26  ;;  %vm823_vm4 = vcmask 1043456   ;;  %vm1247_vm9 = vcmask 97280  }
  0x68   : > { %760 = vrot.lane.b32.xlu0 %v758_v5, %s2485_s26  ;;  %s2491_s11 = smov 64   ;;  %s2492_s8 = smov 112   ;;  %v770_v49 = vld [vmem:[%s2781_s22] sm:$0xf]  ;;  %vm1270_vm10 = vcmask 1045504   ;;  %vm1641_vm14 = vcmask 523264  }
  0x69   : > { %vm721_vm3 = vcmp.ge.s32.totalorder %v2834_v27, %v2836_v28  ;;  %s2493_s6 = smov 72   ;;  %v925_v50 = vsel %vm823_vm4, %v770_v49, 0  ;;  %s2494_s20 = smov 48  }
  0x6a   : > { %750 = vmatpush.bf16.msra.mxu0 %v2081_v3  ;;  %s2495_s19 = smov 56   ;;  %s2496_s25 = smov 40  }
  0x6b   : > { %v2816_v4 = vld [vmem:[#allocation2] sm:$0xff] }
  0x6c   : > { %v726_v6 = vpack.c.bf16 %v2816_v4, %v2816_v4 }
  0x6e   : > { %1993 = vmatmul.msk.bf16.vlgmr.msra.gmra.mxu0 %vm739_vm1, %v726_v6 }
  0xda   : > { %v761_v7 = vpop.permute.xlu0 %760 }
  0xeb   : > { %v752_v8 = vpop.f32.mrf.mxu0 }
  0xec   : > { %v763_v9 = vadd.f32 %v761_v7, %v752_v8  ;;  %v757_v15 = vadd.f32 %v756_v12, %v752_v8 }
  0xee   : > { %v775_v10 = vpack.c.bf16 %v763_v9, %v763_v9  ;;  %v774_v16 = vpack.c.bf16 %v757_v15, %v757_v15 }
  0xf0   : > { %v778_v11 = vunpack.c.l.b16 %v775_v10  ;;  %v842_v17 = vunpack.c.l.b16 %v774_v16 }
  0xf2   : > { %v779_v13 = vpack.c.b16 %v778_v11, %v778_v11  ;;  %v843_v18 = vpack.c.b16 %v842_v17, %v842_v17 }
  0xf3   : > { %v754_v14 = vpop.f32.mrf.mxu0 }
  0xf4   : > { %780 = vrot.lane.b32.xlu0 %v779_v13, %s2486_s28 }
  0xfc   : > { %846 = vrot.lane.b32.xlu0 %v779_v13, %s2487_s3 }
 0x104   : > { %844 = vrot.lane.b32.xlu0 %v843_v18, %s2488_s1 }
 0x10c   : > { %942 = vrot.lane.b32.xlu0 %v779_v13, %s2489_s7 }
 0x114   : > { %1018 = vrot.lane.b32.xlu0 %v843_v18, %s2490_s12 }
 0x166   : > { %v781_v19 = vpop.permute.xlu0 %780 }
 0x167   : > { %v787_v20 = vsel %vm782_vm2, %v781_v19, 0 }
 0x168   : > { %796 = vmatpush.bf16.xpose.msra.mxu1 %v787_v20 }
 0x16e   : > { %v847_v21 = vpop.permute.xlu0 %846 }
 0x16f   : > { %1994 = vmatmul.msk.bf16.vlgmr.msra.gmra.mxu1 %vm782_vm2, %v774_v16  ;;  %v852_v22 = vsel %vm782_vm2, %v847_v21, 0 }
 0x170   : > { %861 = vmatpush.bf16.xpose.msra.mxu3 %v852_v22  ;;  %934 = vmatpush.bf16.msrb.mxu1 %v925_v50 }
 0x176   : > { %v845_v23 = vpop.permute.xlu0 %844 }
 0x177   : > { %1996 = vmatmul.msk.bf16.vlgmr.msra.gmra.mxu3 %vm782_vm2, %v845_v23 }
 0x17e   : > { %v943_v24 = vpop.permute.xlu0 %942 }
 0x17f   : > { %v948_v25 = vsel %vm782_vm2, %v943_v24, 0 }
 0x180   : > { %957 = vmatpush.bf16.xpose.msrb.mxu3 %v948_v25 }
 0x1ec   : > { %v798_v29 = vpop.f32.mrf.mxu1 }
 0x1ed   : > { %v802_v30 = vsel %vm721_vm3, %v798_v29, -1e+09 }
 0x1ee   : > { %v803_v31 = vsel %vm782_vm2, %v802_v30, -inf }
 0x1ef   : > { %804 = vmax.xlane.f32.xlu1 %v803_v31 }
 0x1f4   : > { %v800_v32 = vpop.f32.mrf.mxu1 }
 0x1fa   : > { %v863_v33 = vpop.f32.mrf.mxu3 }
 0x1fb   : > { %v867_v47 = vsel %vm721_vm3, %v863_v33, -1e+09 }
 0x1fc   : > { %v868_v48 = vsel %vm782_vm2, %v867_v47, -inf }
 0x202   : > { %v865_v34 = vpop.f32.mrf.mxu3 }
 0x208   : > { %766 = vrot.lane.b32.xlu1 %v764_v35, %s2491_s11 }
 0x210   : > { %940 = vrot.lane.b32.xlu1 %v843_v18, %s2492_s8 }
 0x262   : > { %v805_v36 = vpop.xlane.xlu1 %804 }
 0x263   : > { %v806_v37 = vsub.f32 %v802_v30, %v805_v36 }
 0x265   : > { %v807_v38 = vmul.f32 1.442695, %v806_v37 }
 0x267   : > { %2221 = vpow2.f32 %v807_v38  ;;  %v771_v38 = vld [vmem:[%s2781_s22 + $0x4] sm:$0xf] }
 0x26d   : > { %v2222_v39 = vpop.eup %2221 }
 0x26e   : > { %v809_v40 = vsel %vm782_vm2, %v2222_v39, 0.0 }
 0x26f   : > { %810 = vadd.xlane.f32.xlu2 %v809_v40 }
 0x27a   : > { %v767_v41 = vpop.permute.xlu1 %766 }
 0x27b   : > { %v769_v42 = vadd.f32 %v767_v41, %v752_v8  ;;  %v1019_v8 = vpop.permute.xlu0 %1018 }
 0x27d   : > { %v776_v43 = vpack.c.bf16 %v769_v42, %v769_v42 }
 0x27f   : > { %v816_v44 = vunpack.c.l.b16 %v776_v43 }
 0x281   : > { %v2848_v46 = vpack.c.b16 %v816_v44, %v816_v44 }
 0x282   : > { %v941_v45 = vpop.permute.xlu1 %940 }
 0x283   : > { %2000 = vmatmul.msk.bf16.vlgmr.msrb.gmra.mxu3 %vm782_vm2, %v941_v45 }
 0x287   : > { %818 = vrot.lane.b32.xlu2 %v2848_v46, %s2491_s11 }
 0x28f   : > { %1020 = vrot.lane.b32.xlu2 %v779_v13, %s2493_s6 }
 0x2b8   : > { %869 = vmax.xlane.f32.xlu2 %v868_v48 }
 0x2e2   : > { %v811_v51 = vpop.xlane.xlu2 %810 }
 0x2e3   : > { %2223 = vrcp.f32 %v811_v51 }
 0x2e9   : > { %v2224_v52 = vpop.eup %2223 }
 0x2ea   : > { %v819_v53 = vpop.permute.xlu2 %818  ;;  %v813_v54 = vmul.f32 %v2224_v52, %v2222_v39  ;;  %v906_v39 = vsel %vm823_vm4, %v771_v38, 0 }
 0x2eb   : > { %v825_v55 = vsel %vm823_vm4, %v819_v53, 0  ;;  %915 = vmatpush.bf16.msrb.mxu0 %v906_v39 }
 0x2ec   : > { %834 = vmatpush.bf16.msra.mxu2 %v825_v55  ;;  %v814_v56 = vpack.c.bf16 %v813_v54, %v813_v54  ;;  %v773_v54 = vld [vmem:[%s2781_s22 + $0xc] sm:$0xf] }
 0x2ed   : > { %v1080_v55 = vsel %vm823_vm4, %v773_v54, 0 }
 0x2ef   : > { %1995 = vmatmul.msk.bf16.vlgmr.msra.gmra.mxu2 %vm782_vm2, %v814_v56 }
 0x2f2   : > { %v1021_v57 = vpop.permute.xlu2 %1020 }
 0x2f3   : > { %v1026_v58 = vsel %vm782_vm2, %v1021_v57, 0 }
 0x2f4   : > { %1035 = vmatpush.bf16.xpose.msra.mxu1 %v1026_v58 }
 0x306   : > { %v959_v59 = vpop.f32.mrf.mxu3 }
 0x307   : > { %v963_v60 = vsel %vm721_vm3, %v959_v59, -1e+09 }
 0x308   : > { %v964_v61 = vsel %vm782_vm2, %v963_v60, -inf }
 0x309   : > { %965 = vmax.xlane.f32.xlu0 %v964_v61 }
 0x30e   : > { %v961_v62 = vpop.f32.mrf.mxu3 }
 0x32b   : > { %v870_v63 = vpop.xlane.xlu2 %869 }
 0x32c   : > { %v871_v0 = vsub.f32 %v867_v47, %v870_v63 }
 0x32e   : > { %v872_v1 = vmul.f32 1.442695, %v871_v0 }
 0x330   : > { %2225 = vpow2.f32 %v872_v1  ;;  %v1096_v1 = vperm.slane %v2814_v2, 3 }
 0x336   : > { %v2226_v3 = vpop.eup %2225 }
 0x337   : > { %v874_v5 = vsel %vm782_vm2, %v2226_v3, 0.0 }
 0x338   : > { %875 = vadd.xlane.f32.xlu2 %v874_v5 }
 0x372   : > { %v836_v6 = vpop.f32.mrf.mxu2 }
 0x373   : > { %v840_v7 = vpack.c.bf16 %v836_v6, %v836_v6 }
 0x375   : > { %1999 = vmatmul.msk.bf16.vlgmr.msrb.gmra.mxu1 %vm782_vm2, %v840_v7 }
 0x37a   : > { %v838_v9 = vpop.f32.mrf.mxu2 }
 0x37c   : > { %v966_v10 = vpop.xlane.xlu0 %965 }
 0x37d   : > { %v967_v11 = vsub.f32 %v963_v60, %v966_v10  ;;  %v2497_v10 = vmov 32.0  }
 0x37f   : > { %v968_v12 = vmul.f32 1.442695, %v967_v11  ;;  %v2086_v11 = vld [vmem:[%s2791_s23 + $0x8] sm:$0xff] }
 0x380   : > { %1196 = vmatpush.bf16.msrb.mxu1 %v2086_v11 }
 0x381   : > { %2227 = vpow2.f32 %v968_v12  ;;  %v2085_v12 = vld [vmem:[%s2791_s23] sm:$0xff] }
 0x384   : > { %1197 = vmatpush.bf16.msrb.mxu1 %v2085_v12 }
 0x385   : > { %2003 = vmatmul.msk.bf16.vlgmr.msra.gmra.mxu1 %vm782_vm2, %v1019_v8 }
 0x387   : > { %v2228_v13 = vpop.eup %2227 }
 0x388   : > { %v970_v14 = vsel %vm782_vm2, %v2228_v13, 0.0 }
 0x389   : > { %971 = vadd.xlane.f32.xlu0 %v970_v14 }
 0x39d   : > { %976 = vrot.lane.b32.xlu0 %v2848_v46, %s2494_s20 }
 0x3ab   : > { %v876_v25 = vpop.xlane.xlu2 %875 }
 0x3f2   : > { %v2870_v15 = vpop.f32.mrf.mxu1 }
 0x3fa   : > { %v938_v16 = vpop.f32.mrf.mxu1 }
 0x3fc   : > { %v972_v29 = vpop.xlane.xlu0 %971 }
 0x402   : > { %v1037_v17 = vpop.f32.mrf.mxu1 }
 0x403   : > { %v1041_v18 = vsel %vm721_vm3, %v1037_v17, -1e+09 }
 0x404   : > { %v1042_v19 = vsel %vm782_vm2, %v1041_v18, -inf }
 0x405   : > { %1043 = vmax.xlane.f32.xlu1 %v1042_v19 }
 0x40a   : > { %v1039_v20 = vpop.f32.mrf.mxu1 }
 0x40f   : > { %v977_v30 = vpop.permute.xlu0 %976 }
 0x410   : > { %v982_v33 = vsel %vm823_vm4, %v977_v30, 0 }
 0x41e   : > { %880 = vrot.lane.b32.xlu1 %v2848_v46, %s2495_s19 }
 0x478   : > { %v1044_v21 = vpop.xlane.xlu1 %1043 }
 0x479   : > { %v1045_v22 = vsub.f32 %v1041_v18, %v1044_v21 }
 0x47b   : > { %v1046_v23 = vmul.f32 1.442695, %v1045_v22 }
 0x47d   : > { %2229 = vpow2.f32 %v1046_v23  ;;  %v2017_v23 = vld [vmem:[%s2773_s5] sm:$0xf] }
 0x47e   : > { %2231 = vrcp.f32 %v876_v25 }
 0x47f   : > { %2233 = vrcp.f32 %v972_v29  ;;  %v2084_v29 = vld [vmem:[%s2786_s29 + $0x8] sm:$0xff] }
 0x483   : > { %v2230_v24 = vpop.eup %2229 }
 0x484   : > { %v1048_v26 = vsel %vm782_vm2, %v2230_v24, 0.0  ;;  %v2232_v27 = vpop.eup %2231 }
 0x485   : > { %1049 = vadd.xlane.f32.xlu2 %v1048_v26  ;;  %v878_v28 = vmul.f32 %v2232_v27, %v2226_v3  ;;  %v2234_v35 = vpop.eup %2233  ;;  %v1207_v26 = vperm.slane %v2814_v2, 6  ;;  %v2083_v27 = vld [vmem:[%s2786_s29] sm:$0xff]  ;;  %s3156_s29 = scalar_lea.vmem [#allocation6], %s2759_s30 }
 0x486   : > { %v974_v36 = vmul.f32 %v2234_v35, %v2228_v13 }
 0x487   : > { %v879_v34 = vpack.c.bf16 %v878_v28, %v878_v28 }
 0x488   : > { %v975_v37 = vpack.c.bf16 %v974_v36, %v974_v36  ;;  %v2913_v36 = vld [vmem:[%s2806_s16 + $0x8] sm:$0x7f] }
 0x489   : > { %v1128_v39 = vperm.slane %v2913_v36, 1 }
 0x490   : > { %v881_v31 = vpop.permute.xlu1 %880 }
 0x491   : > { %v886_v32 = vsel %vm823_vm4, %v881_v31, 0 }
 0x492   : > { %895 = vmatpush.bf16.msrb.mxu2 %v886_v32 }
 0x495   : > { %1997 = vmatmul.msk.bf16.vlgmr.msrb.gmra.mxu2 %vm782_vm2, %v879_v34 }
 0x496   : > { %991 = vmatpush.bf16.msra.mxu2 %v982_v33 }
 0x49a   : > { %1089 = vmatpush.bf16.msrb.mxu2 %v1080_v55 }
 0x49d   : > { %1054 = vrot.lane.b32.xlu2 %v2848_v46, %s2496_s25  ;;  %v772_v46 = vld [vmem:[%s2781_s22 + $0x8] sm:$0xf]  ;;  %s3157_s22 = smov %s3156_s29 }
 0x49e   : > { %v1002_v47 = vsel %vm823_vm4, %v772_v46, 0  ;;  %v1204_v46 = vperm.slane %v2814_v2, 5 }
 0x49f   : > { %1011 = vmatpush.bf16.msra.mxu0 %v1002_v47 }
 0x4a5   : > { %2001 = vmatmul.msk.bf16.vlgmr.msra.gmra.mxu2 %vm782_vm2, %v975_v37 }
 0x4f8   : > { %v1050_v40 = vpop.xlane.xlu2 %1049 }
 0x4f9   : > { %2235 = vrcp.f32 %v1050_v40 }
 0x4fa   : > { %2237 = vrcp.f32 %v2497_v10 }
 0x4ff   : > { %v2236_v41 = vpop.eup %2235 }
 0x500   : > { %v1052_v42 = vmul.f32 %v2236_v41, %v2230_v24  ;;  %v1055_v43 = vpop.permute.xlu2 %1054  ;;  %v2238_v13 = vpop.eup %2237  ;;  %v2080_v24 = vld [vmem:[%s2773_s5] sm:$0x30]  ;;  %v1130_v41 = vperm.slane %v2913_v36, 4 }
 0x501   : > { %v1060_v44 = vsel %vm823_vm4, %v1055_v43, 0  ;;  %v1103_v14 = vmul.f32 32.0, %v2238_v13  ;;  %vm1107_vm5 = vweird.f32 %v2238_v13  ;;  %v2018_v25 = vor.u32 %v2080_v24, %v2017_v23 }
 0x502   : > { %v1053_v45 = vpack.c.bf16 %v1052_v42, %v1052_v42  ;;  %1069 = vmatpush.bf16.msra.mxu3 %v1060_v44 }
 0x503   : > { %2027 = vmatmul.msk.bf16.vlgmr.msrb.gmra.mxu1 %vm739_vm1, %v2018_v25 }
 0x505   : > { %2004 = vmatmul.msk.bf16.vlgmr.msra.gmra.mxu3 %vm782_vm2, %v1053_v45 }
 0x518   : > { %v897_v48 = vpop.f32.mrf.mxu2 }
 0x519   : > { %v901_v49 = vpack.c.bf16 %v897_v48, %v897_v48 }
 0x51b   : > { %1998 = vmatmul.msk.bf16.vlgmr.msrb.gmra.mxu0 %vm782_vm2, %v901_v49 }
 0x51c   : > { %1159 = vmatpush.bf16.msrb.mxu0 %v2084_v29 }
 0x520   : > { %v899_v50 = vpop.f32.mrf.mxu2  ;;  %1160 = vmatpush.bf16.msrb.mxu0 %v2083_v27 }
 0x528   : > { %v993_v51 = vpop.f32.mrf.mxu2 }
 0x529   : > { %v997_v52 = vpack.c.bf16 %v993_v51, %v993_v51 }
 0x52b   : > { %2002 = vmatmul.msk.bf16.vlgmr.msra.gmra.mxu0 %vm782_vm2, %v997_v52 }
 0x530   : > { %v995_v53 = vpop.f32.mrf.mxu2 }
 0x580   : > { %v1199_v47 = vpop.f32.mrf.mxu1 }
 0x581   : > { %v1205_v48 = vadd.f32 %v1204_v46, %v1199_v47 }
 0x583   : > { %v1219_v49 = vpack.c.bf16 %v1205_v48, %v1205_v48 }
 0x585   : > { %v1225_v52 = vunpack.c.l.b16 %v1219_v49 }
 0x588   : > { %v1071_v56 = vpop.f32.mrf.mxu3  ;;  %v1201_v50 = vpop.f32.mrf.mxu1 }
 0x589   : > { %v1075_v57 = vpack.c.bf16 %v1071_v56, %v1071_v56  ;;  %v1206_v51 = vadd.f32 %v1204_v46, %v1201_v50 }
 0x58b   : > { %2005 = vmatmul.msk.bf16.vlgmr.msrb.gmra.mxu2 %vm782_vm2, %v1075_v57  ;;  %v1220_v53 = vpack.c.bf16 %v1206_v51, %v1206_v51  ;;  %v1137_v57 = vperm.slane %v2814_v2, 4 }
 0x58d   : > { %v1226_v54 = vunpack.c.l.b16 %v1220_v53 }
 0x58f   : > { %v1227_v55 = vpack.c.b16 %v1226_v54, %v1225_v52 }
 0x590   : > { %v1073_v58 = vpop.f32.mrf.mxu3 }
 0x591   : > { %v1232_v56 = vsel %vm782_vm2, %v1227_v55, 0 }
 0x592   : > { %1241 = vmatpush.bf16.xpose.msrb.mxu3 %v1232_v56 }
 0x598   : > { %v917_v59 = vpop.f32.mrf.mxu0 }
 0x599   : > { %v937_v61 = vadd.f32 %v2870_v15, %v917_v59  ;;  %v1104_v15 = vsub.f32 1.0, %v1103_v14 }
 0x59b   : > { %v1105_v16 = vmul.f32 %v2238_v13, %v1104_v15 }
 0x59d   : > { %v1106_v17 = vadd.f32 %v2238_v13, %v1105_v16 }
 0x5a0   : > { %v919_v60 = vpop.f32.mrf.mxu0 }
 0x5a8   : > { %v1013_v62 = vpop.f32.mrf.mxu0 }
 0x5a9   : > { %v1017_v63 = vadd.f32 %v1013_v62, %v937_v61 }
 0x5b0   : > { %v1015_v0 = vpop.f32.mrf.mxu0 }
 0x60e   : > { %v1091_v3 = vpop.f32.mrf.mxu2 }
 0x60f   : > { %v1095_v5 = vadd.f32 %v1091_v3, %v1017_v63 }
 0x611   : > { %v1097_v6 = vadd.f32 %v1096_v1, %v1095_v5 }
 0x613   : > { %v1098_v7 = vadd.f32 %v1097_v6, %v2816_v4  ;;  %v2900_v4 = vsel %vm1107_vm5, %v2238_v13, %v1106_v17 }
 0x615   : > { %v1099_v8 = vsel %vm739_vm1, %v1098_v7, 0.0 }
 0x616   : > { %v1093_v9 = vpop.f32.mrf.mxu2  ;;  %1100 = vadd.xlane.f32.xlu1 %v1099_v8 }
 0x62f   : > { %1209 = vrot.lane.b32.xlu1 %v1207_v26, %s2485_s26 }
 0x689   : > { %v1101_v18 = vpop.xlane.xlu1 %1100 }
 0x68a   : > { %v1109_v19 = vmul.f32 %v2900_v4, %v1101_v18 }
 0x68c   : > { %v1110_v20 = vsub.f32 %v1098_v7, %v1109_v19 }
 0x68e   : > { %v1111_v21 = vmul.f32 %v1110_v20, %v1110_v20 }
 0x690   : > { %v1112_v22 = vsel %vm739_vm1, %v1111_v21, 0.0 }
 0x691   : > { %1113 = vadd.xlane.f32.xlu0 %v1112_v22 }
 0x6a1   : > { %v1210_v5 = vpop.permute.xlu1 %1209 }
 0x6a2   : > { %v1212_v6 = vadd.f32 %v1210_v5, %v1199_v47  ;;  %v1213_v7 = vadd.f32 %v1210_v5, %v1201_v50 }
 0x6a4   : > { %v1221_v8 = vpack.c.bf16 %v1212_v6, %v1212_v6  ;;  %v1222_v9 = vpack.c.bf16 %v1213_v7, %v1213_v7 }
 0x6a6   : > { %v1262_v10 = vunpack.c.l.b16 %v1221_v8  ;;  %v1263_v11 = vunpack.c.l.b16 %v1222_v9 }
 0x6a8   : > { %v2930_v12 = vpack.c.b16 %v1263_v11, %v1262_v10 }
 0x704   : > { %v1114_v28 = vpop.xlane.xlu0 %1113 }
 0x705   : > { %v1115_v30 = vmul.f32 %v1114_v28, %v2900_v4 }
 0x707   : > { %v1116_v31 = vadd.f32 1e-05, %v1115_v30 }
 0x709   : > { %2239 = vrsqrt.f32 %v1116_v31  ;;  %vm1123_vm7 = vweird.f32 %v1116_v31 }
 0x70f   : > { %v2240_v32 = vpop.eup %2239 }
 0x710   : > { %v1118_v33 = vmul.f32 %v2240_v32, %v1116_v31  ;;  %vm1124_vm6 = vweird.f32 %v2240_v32 }
 0x711   : > { %vm1125_vm8 = vmor %vm1123_vm7, %vm1124_vm6 }
 0x712   : > { %v1119_v34 = vmul.f32 %v2240_v32, %v1118_v33 }
 0x714   : > { %v1120_v35 = vmul.f32 0.5, %v1119_v34 }
 0x716   : > { %v1121_v37 = vsub.f32 1.5, %v1120_v35 }
 0x718   : > { %v1122_v38 = vmul.f32 %v2240_v32, %v1121_v37 }
 0x71a   : > { %v1126_v40 = vsel %vm1125_vm8, %v2240_v32, %v1122_v38 }
 0x71b   : > { %v1127_v42 = vmul.f32 %v1126_v40, %v1110_v20  ;;  %v1214_v20 = vld [vmem:[%s2796_s24] sm:$0xf] }
 0x71c   : > { %v1371_v21 = vsel %vm823_vm4, %v1214_v20, 0 }
 0x71d   : > { %v1129_v43 = vmul.f32 %v1128_v39, %v1127_v42 }
 0x71f   : > { %v2917_v44 = vadd.f32 %v1130_v41, %v1129_v43 }
 0x721   : > { %v1136_v45 = vpack.c.bf16 %v2917_v44, %v2917_v44 }
 0x723   : > { %2014 = vmatmul.msk.bf16.vlgmr.msrb.gmra.mxu0 %vm739_vm1, %v1136_v45 }
 0x7a0   : > { %v1162_v58 = vpop.f32.mrf.mxu0 }
 0x7a1   : > { %v1163_v59 = vadd.f32 %v1162_v58, %v1137_v57 }
 0x7a3   : > { %v1218_v60 = vpack.c.bf16 %v1163_v59, %v1163_v59 }
 0x7a5   : > { %v1289_v61 = vunpack.c.l.b16 %v1218_v60  ;;  %2028 = vmatmul.msk.bf16.vlgmr.msrb.gmra.mxu3 %vm782_vm2, %v1218_v60 }
 0x7a7   : > { %v1290_v62 = vpack.c.b16 %v1289_v61, %v1289_v61 }
 0x7a8   : > { %v1164_v63 = vpop.f32.mrf.mxu0 }
 0x7a9   : > { %1291 = vrot.lane.b32.xlu1 %v1290_v62, %s2488_s1 }
 0x7b1   : > { %1388 = vrot.lane.b32.xlu1 %v1227_v55, %s2492_s8 }
 0x7b9   : > { %1463 = vrot.lane.b32.xlu1 %v1290_v62, %s2490_s12 }
 0x81b   : > { %v1292_v24 = vpop.permute.xlu1 %1291 }
 0x823   : > { %v1389_v28 = vpop.permute.xlu1 %1388 }
 0x824   : > { %v1394_v32 = vsel %vm782_vm2, %v1389_v28, 0 }
 0x828   : > { %v1243_v0 = vpop.f32.mrf.mxu3 }
 0x829   : > { %v1248_v1 = vsel %vm1247_vm9, %v1243_v0, -inf }
 0x82a   : > { %1249 = vmax.xlane.f32.xlu2 %v1248_v1 }
 0x82b   : > { %v1464_v40 = vpop.permute.xlu1 %1463 }
 0x830   : > { %v1245_v3 = vpop.f32.mrf.mxu3 }
 0x842   : > { %1265 = vrot.lane.b32.xlu2 %v2930_v12, %s2486_s28 }
 0x84a   : > { %1465 = vrot.lane.b32.xlu2 %v1227_v55, %s2490_s12 }
 0x89d   : > { %v1250_v13 = vpop.xlane.xlu2 %1249 }
 0x89e   : > { %v1251_v14 = vsub.f32 %v1243_v0, %v1250_v13 }
 0x8a0   : > { %v1252_v15 = vmul.f32 1.442695, %v1251_v14 }
 0x8a2   : > { %2241 = vpow2.f32 %v1252_v15 }
 0x8a5   : > { %v1266_v16 = vpop.permute.xlu2 %1265 }
 0x8a6   : > { %v1272_v17 = vsel %vm1270_vm10, %v1266_v16, 0 }
 0x8a7   : > { %1281 = vmatpush.bf16.msra.mxu2 %v1272_v17  ;;  %v1215_v17 = vld [vmem:[%s2796_s24 + $0x4] sm:$0xf] }
 0x8a8   : > { %v2242_v18 = vpop.eup %2241 }
 0x8a9   : > { %v1254_v19 = vsel %vm1247_vm9, %v2242_v18, 0.0 }
 0x8aa   : > { %1255 = vadd.xlane.f32.xlu0 %v1254_v19  ;;  %v1216_v19 = vld [vmem:[%s2796_s24 + $0x8] sm:$0xf] }
 0x8ab   : > { %1380 = vmatpush.bf16.msrb.mxu2 %v1371_v21  ;;  %v1447_v20 = vsel %vm823_vm4, %v1216_v19, 0 }
 0x8ad   : > { %v1466_v26 = vpop.permute.xlu2 %1465 }
 0x8ae   : > { %v1471_v27 = vsel %vm782_vm2, %v1466_v26, 0 }
 0x8be   : > { %1293 = vrot.lane.b32.xlu0 %v1227_v55, %s2488_s1 }
 0x8c6   : > { %1386 = vrot.lane.b32.xlu0 %v1290_v62, %s2492_s8 }
 0x91d   : > { %v1256_v22 = vpop.xlane.xlu0 %1255 }
 0x91e   : > { %2243 = vrcp.f32 %v1256_v22 }
 0x924   : > { %v2244_v23 = vpop.eup %2243 }
 0x925   : > { %v1258_v25 = vmul.f32 %v2244_v23, %v2242_v18  ;;  %v1352_v18 = vsel %vm823_vm4, %v1215_v17, 0 }
 0x926   : > { %1361 = vmatpush.bf16.msra.mxu3 %v1352_v18 }
 0x927   : > { %v1259_v29 = vpack.c.bf16 %v1258_v25, %v1258_v25 }
 0x929   : > { %2029 = vmatmul.msk.bf16.vlgmr.msra.gmra.mxu2 %vm1247_vm9, %v1259_v29 }
 0x92a   : > { %1480 = vmatpush.bf16.xpose.msra.mxu2 %v1471_v27  ;;  %1456 = vmatpush.bf16.msrb.mxu3 %v1447_v20 }
 0x930   : > { %v1294_v30 = vpop.permute.xlu0 %1293 }
 0x931   : > { %v1299_v31 = vsel %vm782_vm2, %v1294_v30, 0 }
 0x932   : > { %1308 = vmatpush.bf16.xpose.msra.mxu0 %v1299_v31 }
 0x938   : > { %v1387_v33 = vpop.permute.xlu0 %1386 }
 0x939   : > { %2030 = vmatmul.msk.bf16.vlgmr.msra.gmra.mxu0 %vm782_vm2, %v1292_v24 }
 0x93a   : > { %1403 = vmatpush.bf16.xpose.msrb.mxu0 %v1394_v32  ;;  %v1217_v32 = vld [vmem:[%s2796_s24 + $0xc] sm:$0xf] }
 0x949   : > { %2034 = vmatmul.msk.bf16.vlgmr.msrb.gmra.mxu0 %vm782_vm2, %v1387_v33  ;;  %v1524_v33 = vsel %vm823_vm4, %v1217_v32, 0 }
 0x9ac   : > { %v1283_v34 = vpop.f32.mrf.mxu2 }
 0x9ad   : > { %v1287_v35 = vpack.c.bf16 %v1283_v34, %v1283_v34 }
 0x9af   : > { %2033 = vmatmul.msk.bf16.vlgmr.msrb.gmra.mxu2 %vm782_vm2, %v1287_v35 }
 0x9b4   : > { %v1285_v37 = vpop.f32.mrf.mxu2 }
 0x9b6   : > { %v1310_v38 = vpop.f32.mrf.mxu0 }
 0x9b7   : > { %v1314_v39 = vsel %vm1247_vm9, %v1310_v38, -inf }
 0x9b8   : > { %1315 = vmax.xlane.f32.xlu2 %v1314_v39 }
 0x9be   : > { %v1312_v41 = vpop.f32.mrf.mxu0 }
 0x9bf   : > { %2037 = vmatmul.msk.bf16.vlgmr.msra.gmra.mxu2 %vm782_vm2, %v1464_v40 }
 0x9c6   : > { %v1405_v42 = vpop.f32.mrf.mxu0 }
 0x9c7   : > { %v1409_v43 = vsel %vm1247_vm9, %v1405_v42, -inf }
 0x9c8   : > { %1410 = vmax.xlane.f32.xlu0 %v1409_v43 }
 0x9ce   : > { %v1407_v45 = vpop.f32.mrf.mxu0 }
 0x9cf   : > { %v1540_v45 = vperm.slane %v2814_v2, 7  ;;  %v2088_v2 = vld [vmem:[%s3156_s29 + $0x8] sm:$0xff] }
 0x9dc   : > { %1326 = vrot.lane.b32.xlu0 %v2930_v12, %s2487_s3 }
 0xa2b   : > { %v1316_v46 = vpop.xlane.xlu2 %1315 }
 0xa2c   : > { %v1317_v47 = vsub.f32 %v1310_v38, %v1316_v46 }
 0xa2e   : > { %v1318_v48 = vmul.f32 1.442695, %v1317_v47 }
 0xa30   : > { %2245 = vpow2.f32 %v1318_v48 }
 0xa32   : > { %v2953_v49 = vpop.f32.mrf.mxu2 }
 0xa36   : > { %v2246_v50 = vpop.eup %2245 }
 0xa37   : > { %v1320_v51 = vsel %vm1247_vm9, %v2246_v50, 0.0 }
 0xa38   : > { %1321 = vadd.xlane.f32.xlu2 %v1320_v51 }
 0xa3a   : > { %v1384_v52 = vpop.f32.mrf.mxu2 }
 0xa3b   : > { %v1411_v53 = vpop.xlane.xlu0 %1410 }
 0xa3c   : > { %v1412_v54 = vsub.f32 %v1405_v42, %v1411_v53 }
 0xa3e   : > { %v1413_v55 = vmul.f32 1.442695, %v1412_v54 }
 0xa40   : > { %2247 = vpow2.f32 %v1413_v55 }
 0xa42   : > { %v1482_v56 = vpop.f32.mrf.mxu2 }
 0xa43   : > { %v1486_v57 = vsel %vm1247_vm9, %v1482_v56, -inf }
 0xa44   : > { %1487 = vmax.xlane.f32.xlu1 %v1486_v57  ;;  %v2087_v57 = vld [vmem:[%s3157_s22] sm:$0xff] }
 0xa46   : > { %v2248_v58 = vpop.eup %2247 }
 0xa47   : > { %v1415_v60 = vsel %vm1247_vm9, %v2248_v58, 0.0 }
 0xa4a   : > { %v1484_v59 = vpop.f32.mrf.mxu2 }
 0xa4c   : > { %1416 = vadd.xlane.f32.xlu1 %v1415_v60  ;;  %v2091_v60 = vld [vmem:[%s2801_s17 + $0x10] sm:$0xff] }
 0xa4e   : > { %v1327_v61 = vpop.permute.xlu0 %1326 }
 0xa4f   : > { %v1332_v62 = vsel %vm1270_vm10, %v1327_v61, 0 }
 0xa50   : > { %1341 = vmatpush.bf16.msra.mxu1 %v1332_v62  ;;  %1421 = vrot.lane.b32.xlu2 %v2930_v12, %s2489_s7 }
 0xaab   : > { %v1322_v63 = vpop.xlane.xlu2 %1321 }
 0xaac   : > { %2249 = vrcp.f32 %v1322_v63 }
 0xab2   : > { %v2250_v0 = vpop.eup %2249 }
 0xab3   : > { %v1324_v1 = vmul.f32 %v2250_v0, %v2246_v50  ;;  %v1422_v3 = vpop.permute.xlu2 %1421 }
 0xab4   : > { %v1427_v5 = vsel %vm1270_vm10, %v1422_v3, 0 }
 0xab5   : > { %v1325_v6 = vpack.c.bf16 %v1324_v1, %v1324_v1  ;;  %1436 = vmatpush.bf16.msrb.mxu1 %v1427_v5 }
 0xab7   : > { %v1488_v7 = vpop.xlane.xlu1 %1487  ;;  %2031 = vmatmul.msk.bf16.vlgmr.msra.gmra.mxu1 %vm1247_vm9, %v1325_v6  ;;  %v1565_v6 = vperm.slane %v2913_v36, 2 }
 0xab8   : > { %v1489_v8 = vsub.f32 %v1482_v56, %v1488_v7 }
 0xab9   : > { %1533 = vmatpush.bf16.msra.mxu1 %v1524_v33 }
 0xaba   : > { %v1490_v9 = vmul.f32 1.442695, %v1489_v8  ;;  %v1567_v8 = vperm.slane %v2913_v36, 5 }
 0xabc   : > { %2251 = vpow2.f32 %v1490_v9 }
 0xabf   : > { %v1417_v10 = vpop.xlane.xlu1 %1416 }
 0xac0   : > { %2253 = vrcp.f32 %v1417_v10 }
 0xac2   : > { %v2252_v11 = vpop.eup %2251 }
 0xac3   : > { %v1492_v13 = vsel %vm1247_vm9, %v2252_v11, 0.0 }
 0xac4   : > { %1493 = vadd.xlane.f32.xlu1 %v1492_v13 }
 0xac6   : > { %v2254_v14 = vpop.eup %2253 }
 0xac7   : > { %v1419_v15 = vmul.f32 %v2254_v14, %v2248_v58  ;;  %v2090_v14 = vld [vmem:[%s2801_s17 + $0x8] sm:$0xff] }
 0xac9   : > { %v1420_v16 = vpack.c.bf16 %v1419_v15, %v1419_v15  ;;  %v2089_v15 = vld [vmem:[%s2801_s17] sm:$0xff] }
 0xacb   : > { %2035 = vmatmul.msk.bf16.vlgmr.msrb.gmra.mxu1 %vm1247_vm9, %v1420_v16  ;;  %v2220_v16 = vld [vmem:[%s2808_s18] ss:$0 sm:$0xff]  ;;  %s3158_s18 = sld [smem:[#allocation18_spill]] }
 0xad1   : > { %p2066_p11 = scmp.ne.s32.totalorder %s3158_s18, 1 }
 0xad2   : > { %s3159_s23 = sld [smem:[#allocation39_spill]] (!%p2066_p11) }
 0xad3   : > { %s3160_s13 = sld [smem:[#allocation40_spill]] (!%p2066_p11) }
 0xadd   : > { %1498 = vrot.lane.b32.xlu1 %v2930_v12, %s2493_s6 }
 0xb34   : > { %v1343_v21 = vpop.f32.mrf.mxu1 }
 0xb35   : > { %v1347_v22 = vpack.c.bf16 %v1343_v21, %v1343_v21 }
 0xb37   : > { %2032 = vmatmul.msk.bf16.vlgmr.msra.gmra.mxu3 %vm782_vm2, %v1347_v22  ;;  %v1494_v24 = vpop.xlane.xlu1 %1493  ;;  %v1616_v22 = vperm.slane %v2913_v36, 0 }
 0xb38   : > { %2255 = vrcp.f32 %v1494_v24  ;;  %1599 = vmatpush.bf16.msra.mxu3 %v2088_v2 }
 0xb3c   : > { %v1345_v23 = vpop.f32.mrf.mxu1  ;;  %1600 = vmatpush.bf16.msra.mxu3 %v2087_v57 }
 0xb3e   : > { %v2256_v29 = vpop.eup %2255 }
 0xb3f   : > { %v1496_v12 = vmul.f32 %v2256_v29, %v2252_v11 }
 0xb41   : > { %v1497_v31 = vpack.c.bf16 %v1496_v12, %v1496_v12 }
 0xb48   : > { %v1438_v25 = vpop.f32.mrf.mxu1 }
 0xb49   : > { %v1442_v26 = vpack.c.bf16 %v1438_v25, %v1438_v25 }
 0xb4b   : > { %2036 = vmatmul.msk.bf16.vlgmr.msrb.gmra.mxu3 %vm782_vm2, %v1442_v26 }
 0xb4f   : > { %v1499_v27 = vpop.permute.xlu1 %1498 }
 0xb50   : > { %v1504_v28 = vsel %vm1270_vm10, %v1499_v27, 0  ;;  %v1440_v30 = vpop.f32.mrf.mxu1 }
 0xb51   : > { %1513 = vmatpush.bf16.msra.mxu0 %v1504_v28 }
 0xb54   : > { %2038 = vmatmul.msk.bf16.vlgmr.msra.gmra.mxu0 %vm1247_vm9, %v1497_v31 }
 0xbba   : > { %v1363_v34 = vpop.f32.mrf.mxu3 }
 0xbbb   : > { %v1383_v37 = vadd.f32 %v2953_v49, %v1363_v34 }
 0xbc2   : > { %v1365_v35 = vpop.f32.mrf.mxu3 }
 0xbce   : > { %v1458_v38 = vpop.f32.mrf.mxu3 }
 0xbcf   : > { %v1462_v39 = vadd.f32 %v1458_v38, %v1383_v37 }
 0xbd1   : > { %v1515_v40 = vpop.f32.mrf.mxu0 }
 0xbd2   : > { %v1519_v41 = vpack.c.bf16 %v1515_v40, %v1515_v40 }
 0xbd4   : > { %2039 = vmatmul.msk.bf16.vlgmr.msra.gmra.mxu1 %vm782_vm2, %v1519_v41 }
 0xbd6   : > { %v1460_v42 = vpop.f32.mrf.mxu3 }
 0xbd7   : > { %v1681_v42 = vperm.slane %v2913_v36, 3 }
 0xbd9   : > { %v1517_v43 = vpop.f32.mrf.mxu0 }
 0xc51   : > { %v1535_v46 = vpop.f32.mrf.mxu1 }
 0xc52   : > { %v1539_v47 = vadd.f32 %v1535_v46, %v1462_v39 }
 0xc54   : > { %v1541_v48 = vadd.f32 %v1540_v45, %v1539_v47  ;;  %v1683_v45 = vperm.slane %v2913_v36, 6 }
 0xc56   : > { %v1542_v50 = vadd.f32 %v1541_v48, %v2917_v44  ;;  %v2092_v44 = vld [vmem:[%s2801_s17 + $0x18] sm:$0xff] }
 0xc57   : > { %1649 = vmatpush.bf16.msrb.mxu2 %v2092_v44 }
 0xc58   : > { %v1543_v49 = vsel %vm739_vm1, %v1542_v50, 0.0 }
 0xc59   : > { %v1537_v51 = vpop.f32.mrf.mxu1  ;;  %1544 = vadd.xlane.f32.xlu0 %v1543_v49 }
 0xc5b   : > { %1650 = vmatpush.bf16.msrb.mxu2 %v2091_v60 }
 0xc5f   : > { %1651 = vmatpush.bf16.msrb.mxu2 %v2090_v14 }
 0xc63   : > { %1652 = vmatpush.bf16.msrb.mxu2 %v2089_v15 }
 0xccc   : > { %v1545_v52 = vpop.xlane.xlu0 %1544 }
 0xccd   : > { %v1546_v53 = vmul.f32 %v1545_v52, %v2900_v4 }
 0xccf   : > { %v1547_v54 = vsub.f32 %v1542_v50, %v1546_v53 }
 0xcd1   : > { %v1548_v55 = vmul.f32 %v1547_v54, %v1547_v54 }
 0xcd3   : > { %v1549_v56 = vsel %vm739_vm1, %v1548_v55, 0.0 }
 0xcd4   : > { %1550 = vadd.xlane.f32.xlu2 %v1549_v56 }
 0xd47   : > { %v1551_v58 = vpop.xlane.xlu2 %1550 }
 0xd48   : > { %v1552_v59 = vmul.f32 %v1551_v58, %v2900_v4 }
 0xd4a   : > { %v1553_v61 = vadd.f32 1e-05, %v1552_v59 }
 0xd4c   : > { %2257 = vrsqrt.f32 %v1553_v61  ;;  %vm1560_vm12 = vweird.f32 %v1553_v61 }
 0xd52   : > { %v2258_v62 = vpop.eup %2257 }
 0xd53   : > { %v1555_v63 = vmul.f32 %v2258_v62, %v1553_v61  ;;  %vm1561_vm11 = vweird.f32 %v2258_v62 }
 0xd54   : > { %vm1562_vm13 = vmor %vm1560_vm12, %vm1561_vm11 }
 0xd55   : > { %v1556_v0 = vmul.f32 %v2258_v62, %v1555_v63 }
 0xd57   : > { %v1557_v1 = vmul.f32 0.5, %v1556_v0 }
 0xd59   : > { %v1558_v3 = vsub.f32 1.5, %v1557_v1 }
 0xd5b   : > { %v1559_v5 = vmul.f32 %v2258_v62, %v1558_v3 }
 0xd5d   : > { %v1563_v7 = vsel %vm1562_vm13, %v2258_v62, %v1559_v5 }
 0xd5e   : > { %v1564_v9 = vmul.f32 %v1563_v7, %v1547_v54 }
 0xd60   : > { %v1566_v10 = vmul.f32 %v1565_v6, %v1564_v9 }
 0xd62   : > { %v1568_v11 = vadd.f32 %v1567_v8, %v1566_v10 }
 0xd64   : > { %v1573_v13 = vpack.c.bf16 %v1568_v11, %v1568_v11 }
 0xd66   : > { %2048 = vmatmul.msk.bf16.vlgmr.msra.gmra.mxu3 %vm739_vm1, %v1573_v13 }
 0xde9   : > { %v1602_v17 = vpop.f32.mrf.mxu3 }
 0xdea   : > { %v1603_v18 = vadd.f32 %v2220_v16, %v1602_v17 }
 0xdec   : > { %v1606_v19 = vmax.f32 %v1603_v18, 0.0 }
 0xdee   : > { %v1615_v20 = vpack.c.bf16 %v1606_v19, %v1606_v19 }
 0xdf0   : > { %2065 = vmatmul.msk.bf16.vlgmr.msrb.gmra.mxu2 %vm1641_vm14, %v1615_v20 }
 0xdf1   : > { %v1604_v21 = vpop.f32.mrf.mxu3 }
 0xe73   : > { %v1654_v23 = vpop.f32.mrf.mxu2 }
 0xe74   : > { %v1655_v24 = vadd.f32 %v1654_v23, %v1616_v22 }
 0xe76   : > { %v1658_v25 = vadd.f32 %v1655_v24, %v1568_v11 }
 0xe78   : > { %v1659_v26 = vsel %vm739_vm1, %v1658_v25, 0.0 }
 0xe79   : > { %1660 = vadd.xlane.f32.xlu1 %v1659_v26 }
 0xe7b   : > { %v1656_v29 = vpop.f32.mrf.mxu2 }
 0xeec   : > { %v1661_v12 = vpop.xlane.xlu1 %1660 }
 0xeed   : > { %v1662_v27 = vmul.f32 %v1661_v12, %v2900_v4 }
 0xeef   : > { %v1663_v28 = vsub.f32 %v1658_v25, %v1662_v27 }
 0xef1   : > { %v1664_v30 = vmul.f32 %v1663_v28, %v1663_v28 }
 0xef3   : > { %v1665_v31 = vsel %vm739_vm1, %v1664_v30, 0.0 }
 0xef4   : > { %1666 = vadd.xlane.f32.xlu0 %v1665_v31 }
 0xf67   : > { %v1667_v32 = vpop.xlane.xlu0 %1666 }
 0xf68   : > { %v1668_v33 = vmul.f32 %v1667_v32, %v2900_v4 }
 0xf6a   : > { %v1669_v34 = vadd.f32 1e-05, %v1668_v33 }
 0xf6c   : > { %2259 = vrsqrt.f32 %v1669_v34  ;;  %vm1676_vm0 = vweird.f32 %v1669_v34 }
 0xf72   : > { %v2260_v35 = vpop.eup %2259 }
 0xf73   : > { %v1671_v37 = vmul.f32 %v2260_v35, %v1669_v34  ;;  %vm1677_vm15 = vweird.f32 %v2260_v35 }
 0xf74   : > { %vm1678_vm2 = vmor %vm1676_vm0, %vm1677_vm15 }
 0xf75   : > { %v1672_v38 = vmul.f32 %v2260_v35, %v1671_v37 }
 0xf77   : > { %v1673_v39 = vmul.f32 0.5, %v1672_v38 }
 0xf79   : > { %v1674_v40 = vsub.f32 1.5, %v1673_v39 }
 0xf7b   : > { %v1675_v41 = vmul.f32 %v2260_v35, %v1674_v40 }
 0xf7d   : > { %v1679_v43 = vsel %vm1678_vm2, %v2260_v35, %v1675_v41 }
 0xf7e   : > { %v1680_v46 = vmul.f32 %v1679_v43, %v1663_v28 }
 0xf80   : > { %v1682_v47 = vmul.f32 %v1681_v42, %v1680_v46  ;;  %1689 = sbr.rel (%p2066_p11) target bundleno = 4242 (0x1092), region = 92 }
 0xf82   : > { %v1684_v48 = vadd.f32 %v1683_v45, %v1682_v47 }
 0xf84   : > { %1685 = vst.msk [vmem:[#allocation2] sm:$0xff] %vm739_vm1, %v1684_v48 }
 0xf85   : > { %v1692_v50 = vsel %vm739_vm1, %v1684_v48, 0.0  ;;  %v2261_v61 = vld [vmem:[%s3159_s23] ss:$0 sm:$0xff] }
 0xf86   : > { %1693 = vadd.xlane.f32.xlu0 %v1692_v50 }
 0xff9   : > { %v1694_v49 = vpop.xlane.xlu0 %1693 }
 0xffa   : > { %v1695_v51 = vmul.f32 %v1694_v49, %v2900_v4 }
 0xffc   : > { %v1696_v52 = vsub.f32 %v1684_v48, %v1695_v51 }
 0xffe   : > { %v1697_v53 = vmul.f32 %v1696_v52, %v1696_v52 }
0x1000   : > { %v1698_v54 = vsel %vm739_vm1, %v1697_v53, 0.0 }
0x1001   : > { %1699 = vadd.xlane.f32.xlu0 %v1698_v54 }
0x1074   : > { %v1700_v36 = vpop.xlane.xlu0 %1699 }
0x1075   : > { %v1701_v55 = vmul.f32 %v1700_v36, %v2900_v4  ;;  %v2262_v4 = vld [vmem:[%s3160_s13] ss:$0 sm:$0xff] }
0x1077   : > { %v1702_v56 = vadd.f32 1e-05, %v1701_v55 }
0x1079   : > { %2263 = vrsqrt.f32 %v1702_v56  ;;  %vm1709_vm4 = vweird.f32 %v1702_v56 }
0x107f   : > { %v2264_v2 = vpop.eup %2263 }
0x1080   : > { %v1704_v57 = vmul.f32 %v2264_v2, %v1702_v56  ;;  %vm1710_vm3 = vweird.f32 %v2264_v2 }
0x1081   : > { %vm1711_vm5 = vmor %vm1709_vm4, %vm1710_vm3 }
0x1082   : > { %v1705_v44 = vmul.f32 %v2264_v2, %v1704_v57 }
0x1084   : > { %v1706_v58 = vmul.f32 0.5, %v1705_v44 }
0x1086   : > { %v1707_v59 = vsub.f32 1.5, %v1706_v58 }
0x1088   : > { %v1708_v60 = vmul.f32 %v2264_v2, %v1707_v59 }
0x108a   : > { %v1712_v62 = vsel %vm1711_vm5, %v2264_v2, %v1708_v60 }
0x108b   : > { %v1713_v63 = vmul.f32 %v1712_v62, %v1696_v52 }
0x108d   : > { %v1717_v0 = vmul.f32 %v2261_v61, %v1713_v63 }
0x108f   : > { %v1721_v1 = vadd.f32 %v2262_v4, %v1717_v0 }
0x1091   : > { %1722 = vst.msk [vmem:[%s2810_s27] sm:$0xff] %vm739_vm1, %v1721_v1 }
0x1092 PF: > { %s2068_s9 = sshll.u32 %s2469_s15, 3  ;;  %s3162_s0 = sld [smem:[#allocation41_spill]] }
0x1093   : > { %s1736_s16 = sshll.u32 %s2810_s27, 4  ;;  %s1724_s28 = scalar_lea.sflag [#allocation5], %s2749_s14  ;;  %s1737_s16 = int_to_ptr.vmem [resolvable:$true] %s1736_s16 }
0x1098   : > { %s1734_s10 = scalar_lea.hbm %s3162_s0, %s2068_s9  ;;  %s2375_s15 = scalar_lea.hbm %s3162_s0, 16 }
0x1099   : > { %s1738_s26 = sshll.u32 %s1734_s10, 4  ;;  %s1739_s26 = int_to_ptr.hbm [resolvable:$true] %s1738_s26 }
0x109a   : > { %s2369_s3 = sshra.s32 %s1739_s26, 4  ;;  %s2370_s3 = int_to_ptr.hbm [resolvable:$true] %s2369_s3 }
0x109b   : > { %s2371_s1 = scalar_lea.hbm %s2370_s3, 8  ;;  %p2376_p0 = scmp.lt.s32.totalorder %s2370_s3, %s3162_s0 }
0x109c   : > { %p2372_p12 = scmp.ne.s32.totalorder %s2370_s3, %s2371_s1  ;;  %p2377_p7 = scmp.lt.s32.totalorder %s2375_s15, %s2371_s1 }
0x109e   : > { %p2373_p3 = pnand %p2372_p12, %p2709_p13  ;;  %p2378_p9 = por %p2377_p7, %p2376_p0 }
0x10a0   : > { %p2374_p6 = pneg %p2373_p3 }
0x10a2   : > { %p2379_p10 = pnand %p2378_p9, %p2374_p6 }
0x10a4   : > { %2382 = shalt.err (!%p2379_p10)
}
0x10a5   : > { %2099 = dma.vmem_to_hbm [thread:$0]  (%p2709_p13), %s1737_s16, 128, %s1739_s26, %s1724_s28  }
0x10a6 PF: > { %s3163_s14 = sld [smem:[#allocation21_spill]] }
0x10a7   : > { %s3164_s27 = sld [smem:[#allocation15_spill]] }
0x10ac   : > { %p2116_p1 = scmp.ge.s32.totalorder %s3163_s14, 2 }
0x10ad   : > { %s1750_s20 = sand.u32 1, %s3164_s27  }
0x10ae   : > { %p2112_p4 = pnand %p2116_p1, %p2725_p2  ;;  %s1751_s19 = scalar_lea.sflag [#allocation5], %s1750_s20 }
0x10b0   : > { %p2113_p5 = pneg %p2112_p4 }
0x10b2   : > { %2436 = dma.done.wait (%p2113_p5), %s1751_s19, 128  }
0x10b3   : > { %2438 = vsyncadd (%p2113_p5), %s1751_s19, 4294967168  ;;  %s32_s18 = sadd.s32 1, %s3163_s14   ;;  %s3166_s25 = sld [smem:[#allocation13_spill]] }
0x10b4   : > { %p29_p8 = scmp.ge.s32.totalorder %s32_s18, 6   ;;  %s3167_s26 = sld [smem:[#allocation14_spill]] }
0x10b5   : > { %s3168_s27 = sld [smem:[#allocation25_spill]] }
0x10b6   : > { %s3169_s28 = sld [smem:[#allocation16_spill]] }
0x10b7   : > { %s3170_s29 = sld [smem:[#allocation17_spill]] }
0x10b8   : > { %s3171_s30 = sld [smem:[#allocation26_spill]]  ;;  %31 = sbr.rel (!%p29_p8) target bundleno = 26 (0x1a), region = 173 }
0x10b9   : > { %s3172_s14 = sld [smem:[#allocation19_spill]] }
0x10ba   : > { %s3173_s15 = sld [smem:[#allocation20_spill]] }
0x10bb   : > { %s3174_s16 = sld [smem:[#allocation22_spill]] }
0x10bc   : > { %s3175_s17 = sld [smem:[#allocation23_spill]] }
0x10bd   :  { %1757 = vsyncpa [#allocation4], 1 }
0x10be   :  { %1759 = vsyncpa [#allocation4 + $0x1], 1 }
0x10bf   :  { %1760 = vsyncpa [#allocation7], 1 }
0x10c0   :  { %1762 = vsyncpa [#allocation7 + $0x1], 1 }
0x10c1   :  { %1763 = vsyncpa [#allocation5], 1 }
0x10c2   :  { %1765 = vsyncpa [#allocation5 + $0x1], 1 }

</bundles_post_ra>
